<compile_context>
chip_gen: v6e
topology: v6e:2x2x1
jax: 0.10.0
libtpu: 0.0.40
codegen_flags: <defaults>
</compile_context>

<pallas_src>
import jax
import jax.numpy as jnp
from jax.experimental import pallas as pl
from jax.experimental.pallas import tpu as pltpu

MAXPAD = 4                # max dilation / padding among the 4 branches
DILATIONS = (1, 2, 3, 4)
C_BRANCH = 64             # out channels of each dilated conv
C_CAT = 4 * C_BRANCH      # 256, concat width
C_MID = 128               # out channels of the 1x1 conv


def _disc_kernel(p_ref, wblk_ref, bcat_ref, w1x1_ref, b1x1_ref,
                 wfc_ref, bfc_ref, out_ref):
    # p_ref:    (Bt, HW, Kp)   im2col patches (lane-dense, zero-padded K)
    # wblk_ref: (Kp, 256)      block-diagonal conv weights (concat order)
    # bcat_ref: (1, 256)       concatenated conv biases
    # w1x1_ref: (256, 128)     1x1 conv weight
    # b1x1_ref: (1, 128)
    # wfc_ref:  (128, NCp)     FC weight, lane-padded
    # bfc_ref:  (1, NCp)
    # out_ref:  (Bt, NCp)      per-step output row block
    Bt, HW, Kp = p_ref.shape

    x = p_ref[...].reshape(Bt * HW, Kp)

    # four dilated 3x3 convs + concat == one block-diagonal matmul
    cat = jnp.dot(x, wblk_ref[...], preferred_element_type=jnp.float32)
    cat = jnp.maximum(cat + bcat_ref[...], 0.0)                  # (Bt*HW, 256)

    # fused 1x1 conv
    mid = jnp.dot(cat, w1x1_ref[...], preferred_element_type=jnp.float32)
    mid = jnp.maximum(mid + b1x1_ref[...], 0.0)                  # (Bt*HW, 128)

    # global average pool per batch element (sum over HW, scale)
    pooled = jnp.sum(mid.reshape(Bt, HW, C_MID), axis=1) * (1.0 / HW)  # (Bt,128)

    # final FC
    logits = jnp.dot(pooled, wfc_ref[...],
                     preferred_element_type=jnp.float32) + bfc_ref[...]
    out_ref[...] = logits.astype(out_ref.dtype)


def _choose_batch_tile(B, HW):
    """Pick batch elements per grid step; target a few thousand matmul rows."""
    rows_target = 4096
    bt = max(1, min(B, rows_target // max(HW, 1)))
    if bt >= B:
        return B                       # single grid step, block == full batch
    # multiple steps: keep the output row-block sublane-friendly
    return max(8, (bt // 8) * 8)


def domain_discriminator(x_nchw, params):
    """Pallas forward pass. x_nchw: (B, Cin, H, W) like the PyTorch module."""
    x = jnp.transpose(x_nchw, (0, 2, 3, 1)).astype(jnp.float32)   # -> NHWC
    B, H, W, Cin = x.shape
    HW = H * W
    x_pad = jnp.pad(x, ((0, 0), (MAXPAD, MAXPAD), (MAXPAD, MAXPAD), (0, 0)))

    # ---- wrapper-side im2col over all 4 branches (lane-dense LHS) ----------
    cols = []
    for d in DILATIONS:
        for kh in range(3):
            for kw in range(3):
                h0 = MAXPAD - d + kh * d
                w0 = MAXPAD - d + kw * d
                cols.append(jax.lax.slice(
                    x_pad, (0, h0, w0, 0), (B, h0 + H, w0 + W, Cin)))
    K = 4 * 9 * Cin
    K_PAD = ((K + 127) // 128) * 128
    patches = jnp.concatenate(cols, axis=-1).reshape(B, HW, K)
    patches = jnp.pad(patches, ((0, 0), (0, 0), (0, K_PAD - K)))

    # ---- pack weights: block-diagonal conv weight, padded FC ---------------
    wconv_hwio = params["wconv_hwio"].astype(jnp.float32)        # (4,3,3,Cin,64)
    kb = 9 * Cin
    wblk = jnp.zeros((K_PAD, C_CAT), jnp.float32)
    for b in range(4):
        wb = wconv_hwio[b].reshape(kb, C_BRANCH)
        wblk = wblk.at[b * kb:(b + 1) * kb,
                       b * C_BRANCH:(b + 1) * C_BRANCH].set(wb)
    bcat = params["bconv"].reshape(1, C_CAT).astype(jnp.float32)
    w1x1 = params["w1x1"].astype(jnp.float32)                    # (256, 128)
    b1x1 = params["b1x1"].astype(jnp.float32)                    # (1, 128)
    wfc = params["wfc"].astype(jnp.float32)                      # (128, NC)
    bfc = params["bfc"].astype(jnp.float32)                      # (1, NC)
    NC = wfc.shape[1]
    NC_PAD = ((max(NC, 1) + 127) // 128) * 128
    wfc_p = jnp.pad(wfc, ((0, 0), (0, NC_PAD - NC)))
    bfc_p = jnp.pad(bfc, ((0, 0), (0, NC_PAD - NC)))

    # ---- batch tiling -------------------------------------------------------
    Bt = _choose_batch_tile(B, HW)
    num_steps = -(-B // Bt)
    B_pad = Bt * num_steps
    if B_pad != B:
        patches = jnp.pad(patches, ((0, B_pad - B), (0, 0), (0, 0)))

    grid_spec = pltpu.PrefetchScalarGridSpec(
        num_scalar_prefetch=0,
        grid=(num_steps,),
        in_specs=[
            pl.BlockSpec((Bt, HW, K_PAD), lambda i: (i, 0, 0)),
            pl.BlockSpec(wblk.shape, lambda i: (0, 0)),
            pl.BlockSpec(bcat.shape, lambda i: (0, 0)),
            pl.BlockSpec(w1x1.shape, lambda i: (0, 0)),
            pl.BlockSpec(b1x1.shape, lambda i: (0, 0)),
            pl.BlockSpec(wfc_p.shape, lambda i: (0, 0)),
            pl.BlockSpec(bfc_p.shape, lambda i: (0, 0)),
        ],
        out_specs=pl.BlockSpec((Bt, NC_PAD), lambda i: (i, 0)),
    )

    out = pl.pallas_call(
        _disc_kernel,
        out_shape=jax.ShapeDtypeStruct((B_pad, NC_PAD), jnp.float32),
        grid_spec=grid_spec,
        compiler_params=pltpu.CompilerParams(
            dimension_semantics=("parallel",)),
    )(patches, wblk, bcat, w1x1, b1x1, wfc_p, bfc_p)

    return out[:B, :NC]


def init_params(key, input_channels, num_classes):
    """Deterministic synthetic parameters (shapes match the nn.Module)."""
    ks = jax.random.split(key, 6)
    wconv_hwio = 0.1 * jax.random.normal(
        ks[0], (4, 3, 3, input_channels, C_BRANCH), jnp.float32)
    bconv = 0.1 * jax.random.normal(ks[1], (4, C_BRANCH), jnp.float32)
    w1x1 = 0.05 * jax.random.normal(ks[2], (C_CAT, C_MID), jnp.float32)
    b1x1 = 0.05 * jax.random.normal(ks[3], (1, C_MID), jnp.float32)
    wfc = 0.05 * jax.random.normal(ks[4], (C_MID, num_classes), jnp.float32)
    bfc = 0.05 * jax.random.normal(ks[5], (1, num_classes), jnp.float32)
    return {
        "wconv_hwio": wconv_hwio,
        "bconv": bconv,
        "w1x1": w1x1,
        "b1x1": b1x1,
        "wfc": wfc,
        "bfc": bfc,
    }


def reference_forward(x_nchw, params):
    """Pure-JAX reference of the PyTorch forward (for correctness check)."""
    x = jnp.transpose(x_nchw, (0, 2, 3, 1)).astype(jnp.float32)   # NHWC
    outs = []
    for b, d in enumerate(DILATIONS):
        w = params["wconv_hwio"][b]                               # (3,3,Cin,64)
        y = jax.lax.conv_general_dilated(
            x, w, window_strides=(1, 1), padding=[(d, d), (d, d)],
            rhs_dilation=(d, d),
            dimension_numbers=("NHWC", "HWIO", "NHWC"))
        outs.append(jax.nn.relu(y + params["bconv"][b]))
    cat = jnp.concatenate(outs, axis=-1)                          # (B,H,W,256)
    mid = jax.nn.relu(jnp.einsum("bhwc,co->bhwo", cat, params["w1x1"])
                      + params["b1x1"][0])
    pooled = jnp.mean(mid, axis=(1, 2))                           # (B, 128)
    return pooled @ params["wfc"] + params["bfc"]                 # (B, NC)


if __name__ == "__main__":
    B, Cin, H, W = 2, 4, 16, 16
    num_classes = 2

    key = jax.random.PRNGKey(0)
    kx, kp = jax.random.split(key)
    x = jax.random.normal(kx, (B, Cin, H, W), jnp.float32)        # NCHW, like PyTorch
    params = init_params(kp, Cin, num_classes)

    out = domain_discriminator(x, params)
    out = jax.block_until_ready(out)

    ref = jax.block_until_ready(reference_forward(x, params))
    assert out.shape == (B, num_classes)
    assert jnp.allclose(out, ref, rtol=5e-3, atol=5e-3), (out, ref)

    print("KERNEL_OK")
</pallas_src>

<mosaic_0001>
module attributes {stable_mosaic.version = 11 : i64} {
  func.func @_disc_kernel(%arg0: i32, %arg1: memref<2x256x256xf32, #tpu.memory_space<vmem>>, %arg2: memref<256x256xf32, #tpu.memory_space<vmem>>, %arg3: memref<1x256xf32, #tpu.memory_space<vmem>>, %arg4: memref<256x128xf32, #tpu.memory_space<vmem>>, %arg5: memref<1x128xf32, #tpu.memory_space<vmem>>, %arg6: memref<128x128xf32, #tpu.memory_space<vmem>>, %arg7: memref<1x128xf32, #tpu.memory_space<vmem>>, %arg8: memref<2x128xf32, #tpu.memory_space<vmem>>) attributes {dimension_semantics = [#tpu.dimension_semantics<parallel>], iteration_bounds = array<i64: 1>, scalar_prefetch = 0 : i64, scratch_operands = 0 : i64, tpu.core_type = #tpu.core_type<tc>, window_params = [{transform_indices = @transform_0, window_bounds = array<i64: 2, 256, 256>}, {pipeline_mode = #tpu.pipeline_mode<synchronous>, transform_indices = @transform_1, window_bounds = array<i64: 256, 256>}, {pipeline_mode = #tpu.pipeline_mode<synchronous>, transform_indices = @transform_2, window_bounds = array<i64: 1, 256>}, {pipeline_mode = #tpu.pipeline_mode<synchronous>, transform_indices = @transform_3, window_bounds = array<i64: 256, 128>}, {pipeline_mode = #tpu.pipeline_mode<synchronous>, transform_indices = @transform_4, window_bounds = array<i64: 1, 128>}, {pipeline_mode = #tpu.pipeline_mode<synchronous>, transform_indices = @transform_5, window_bounds = array<i64: 128, 128>}, {pipeline_mode = #tpu.pipeline_mode<synchronous>, transform_indices = @transform_6, window_bounds = array<i64: 1, 128>}, {transform_indices = @transform_7, window_bounds = array<i64: 2, 128>}]} {
    %c0 = arith.constant 0 : index
    %c0_0 = arith.constant 0 : index
    %c0_1 = arith.constant 0 : index
    %0 = vector.load %arg1[%c0, %c0_0, %c0_1] : memref<2x256x256xf32, #tpu.memory_space<vmem>>, vector<2x256x256xf32>
    %1 = vector.shape_cast %0 : vector<2x256x256xf32> to vector<512x256xf32>
    %c0_2 = arith.constant 0 : index
    %c0_3 = arith.constant 0 : index
    %2 = vector.load %arg2[%c0_2, %c0_3] : memref<256x256xf32, #tpu.memory_space<vmem>>, vector<256x256xf32>
    %cst = arith.constant dense<0.000000e+00> : vector<512x256xf32>
    %3 = tpu.matmul %1, %2, %cst {dimension_numbers = #tpu.dot_dimension_numbers<[1], [0], [0], [1], [0, 0, 1, 1], [], []>} : vector<512x256xf32>, vector<256x256xf32>, vector<512x256xf32> -> vector<512x256xf32>
    %c0_4 = arith.constant 0 : index
    %c0_5 = arith.constant 0 : index
    %4 = vector.load %arg3[%c0_4, %c0_5] : memref<1x256xf32, #tpu.memory_space<vmem>>, vector<1x256xf32>
    %5 = vector.broadcast %4 : vector<1x256xf32> to vector<512x256xf32>
    %6 = arith.addf %3, %5 : vector<512x256xf32>
    %cst_6 = arith.constant 0.000000e+00 : f32
    %7 = vector.broadcast %cst_6 : f32 to vector<512x256xf32>
    %8 = arith.maximumf %6, %7 : vector<512x256xf32>
    %c0_7 = arith.constant 0 : index
    %c0_8 = arith.constant 0 : index
    %9 = vector.load %arg4[%c0_7, %c0_8] : memref<256x128xf32, #tpu.memory_space<vmem>>, vector<256x128xf32>
    %cst_9 = arith.constant dense<0.000000e+00> : vector<512x128xf32>
    %10 = tpu.matmul %8, %9, %cst_9 {dimension_numbers = #tpu.dot_dimension_numbers<[1], [0], [0], [1], [0, 0, 1, 1], [], []>} : vector<512x256xf32>, vector<256x128xf32>, vector<512x128xf32> -> vector<512x128xf32>
    %c0_10 = arith.constant 0 : index
    %c0_11 = arith.constant 0 : index
    %11 = vector.load %arg5[%c0_10, %c0_11] : memref<1x128xf32, #tpu.memory_space<vmem>>, vector<1x128xf32>
    %12 = vector.broadcast %11 : vector<1x128xf32> to vector<512x128xf32>
    %13 = arith.addf %10, %12 : vector<512x128xf32>
    %cst_12 = arith.constant 0.000000e+00 : f32
    %14 = vector.broadcast %cst_12 : f32 to vector<512x128xf32>
    %15 = arith.maximumf %13, %14 : vector<512x128xf32>
    %16 = vector.shape_cast %15 : vector<512x128xf32> to vector<2x256x128xf32>
    %cst_13 = arith.constant dense<0.000000e+00> : vector<2x128xf32>
    %17 = vector.multi_reduction <add>, %16, %cst_13 [1] : vector<2x256x128xf32> to vector<2x128xf32>
    %cst_14 = arith.constant 3.906250e-03 : f32
    %18 = vector.broadcast %cst_14 : f32 to vector<2x128xf32>
    %19 = arith.mulf %17, %18 : vector<2x128xf32>
    %c0_15 = arith.constant 0 : index
    %c0_16 = arith.constant 0 : index
    %20 = vector.load %arg6[%c0_15, %c0_16] : memref<128x128xf32, #tpu.memory_space<vmem>>, vector<128x128xf32>
    %cst_17 = arith.constant dense<0.000000e+00> : vector<2x128xf32>
    %21 = tpu.matmul %19, %20, %cst_17 {dimension_numbers = #tpu.dot_dimension_numbers<[1], [0], [0], [1], [0, 0, 1, 1], [], []>} : vector<2x128xf32>, vector<128x128xf32>, vector<2x128xf32> -> vector<2x128xf32>
    %c0_18 = arith.constant 0 : index
    %c0_19 = arith.constant 0 : index
    %22 = vector.load %arg7[%c0_18, %c0_19] : memref<1x128xf32, #tpu.memory_space<vmem>>, vector<1x128xf32>
    %23 = vector.broadcast %22 : vector<1x128xf32> to vector<2x128xf32>
    %24 = arith.addf %21, %23 : vector<2x128xf32>
    %c0_20 = arith.constant 0 : index
    %c0_21 = arith.constant 0 : index
    %25 = vector.load %arg8[%c0_20, %c0_21] : memref<2x128xf32, #tpu.memory_space<vmem>>, vector<2x128xf32>
    tpu.vector_store %arg8[%c0_20, %c0_21], %24 {strides = array<i32>} : memref<2x128xf32, #tpu.memory_space<vmem>>, vector<2x128xf32>,
    return
  }
  func.func @transform_0(%arg0: i32) -> (i32, i32, i32) {
    %c0_i32 = arith.constant 0 : i32
    %c0_i32_0 = arith.constant 0 : i32
    %c0_i32_1 = arith.constant 0 : i32
    return %arg0, %c0_i32, %c0_i32_0 : i32, i32, i32
  }
  func.func @transform_1(%arg0: i32) -> (i32, i32) {
    %c0_i32 = arith.constant 0 : i32
    %c0_i32_0 = arith.constant 0 : i32
    %c0_i32_1 = arith.constant 0 : i32
    return %c0_i32, %c0_i32_0 : i32, i32
  }
  func.func @transform_2(%arg0: i32) -> (i32, i32) {
    %c0_i32 = arith.constant 0 : i32
    %c0_i32_0 = arith.constant 0 : i32
    %c0_i32_1 = arith.constant 0 : i32
    return %c0_i32, %c0_i32_0 : i32, i32
  }
  func.func @transform_3(%arg0: i32) -> (i32, i32) {
    %c0_i32 = arith.constant 0 : i32
    %c0_i32_0 = arith.constant 0 : i32
    %c0_i32_1 = arith.constant 0 : i32
    return %c0_i32, %c0_i32_0 : i32, i32
  }
  func.func @transform_4(%arg0: i32) -> (i32, i32) {
    %c0_i32 = arith.constant 0 : i32
    %c0_i32_0 = arith.constant 0 : i32
    %c0_i32_1 = arith.constant 0 : i32
    return %c0_i32, %c0_i32_0 : i32, i32
  }
  func.func @transform_5(%arg0: i32) -> (i32, i32) {
    %c0_i32 = arith.constant 0 : i32
    %c0_i32_0 = arith.constant 0 : i32
    %c0_i32_1 = arith.constant 0 : i32
    return %c0_i32, %c0_i32_0 : i32, i32
  }
  func.func @transform_6(%arg0: i32) -> (i32, i32) {
    %c0_i32 = arith.constant 0 : i32
    %c0_i32_0 = arith.constant 0 : i32
    %c0_i32_1 = arith.constant 0 : i32
    return %c0_i32, %c0_i32_0 : i32, i32
  }
  func.func @transform_7(%arg0: i32) -> (i32, i32) {
    %c0_i32 = arith.constant 0 : i32
    %c0_i32_0 = arith.constant 0 : i32
    return %arg0, %c0_i32 : i32, i32
  }
}

</mosaic_0001>

<bundles_post_ra>
// kernel: tpu_custom_call.1
= control target key start
LH: loop header
LB: loop body
LE: loop exit
PB: predicated region body
PF: predicated region fallthrough
CT: control target
= control target key end

     0   :  { %12 = vsyncpa [#allocation3], 0  ;;  %s2042_s0 = inlined_call_operand.hbm [shape: f32[2,256,256], index: 0, kind: input, shape index: {}]   ;;  %s2043_s1 = inlined_call_operand.hbm [shape: f32[256,256], index: 1, kind: input, shape index: {}]   ;;  %s2044_s2 = inlined_call_operand.vmem [shape: f32[1,256], index: 2, kind: input, shape index: {}]   ;;  %s2045_s3 = inlined_call_operand.hbm [shape: f32[256,128], index: 3, kind: input, shape index: {}]   ;;  %s2046_s4 = inlined_call_operand.vmem [shape: f32[1,128], index: 4, kind: input, shape index: {}]   ;;  %s2047_s5 = inlined_call_operand.hbm [shape: f32[128,128], index: 5, kind: input, shape index: {}]   ;;  %s2048_s6 = inlined_call_operand.vmem [shape: f32[1,128], index: 6, kind: input, shape index: {}]   ;;  %s2049_s7 = inlined_call_operand.hbm [shape: f32[2,128], index: 7, kind: output, shape index: {}]  }
   0x1   :  { %13 = vsyncpa [#allocation6], 0 }
   0x2   :  { %14 = vsyncpa [#allocation9], 0 }
   0x3   :  { %15 = vsyncpa [#allocation4], 0  ;;  %s1716_s24 = smov [#allocation5]   ;;  %s1717_s26 = smov [#allocation2]  }
   0x4   :  { %s33_s25 = sshll.u32 %s1716_s24, 4  ;;  %s21_s27 = sshll.u32 %s1717_s26, 4  ;;  %s34_s25 = int_to_ptr.vmem [resolvable:$true] %s33_s25  ;;  %s22_s27 = int_to_ptr.vmem [resolvable:$true] %s21_s27 }
   0x5   :  { %s1616_s28 = scalar_lea.vmem %s34_s25, 8192  ;;  %p1621_p1 = scmp.lt.s32.totalorder %s34_s25, %s34_s25 }
   0x6   :  { %p1617_p0 = scmp.ne.s32.totalorder %s34_s25, %s1616_s28  ;;  %p1622_p2 = scmp.lt.s32.totalorder %s1616_s28, %s1616_s28 }
   0x8   :  { %p1623_p3 = por %p1622_p2, %p1621_p1 }
   0xa   :  { %p1624_p4 = pnand %p1623_p3, %p1617_p0 }
   0xc   :  { %1627 = shalt.err (!%p1624_p4)
}
   0xd   :  { %s1718_s29 = smov 256   ;;  %s1719_s30 = smov 16  }
   0xe   :  { %39 = dma.hbm_to_vmem [thread:$0]  %s2043_s1, 8192, %s34_s25, [#allocation6], %s1718_s29, %s1718_s29, %s1719_s30  }
   0xf   :  { %s1636_s10 = scalar_lea.vmem %s22_s27, 16384  ;;  %p1641_p6 = scmp.lt.s32.totalorder %s22_s27, %s22_s27 }
  0x10   :  { %p1637_p5 = scmp.ne.s32.totalorder %s22_s27, %s1636_s10  ;;  %p1642_p7 = scmp.lt.s32.totalorder %s1636_s10, %s1636_s10 }
  0x12   :  { %p1643_p8 = por %p1642_p7, %p1641_p6 }
  0x14   :  { %p1644_p9 = pnand %p1643_p8, %p1637_p5 }
  0x16   :  { %1647 = shalt.err (!%p1644_p9)
}
  0x17   :  { %27 = dma.hbm_to_vmem [thread:$0]  %s2042_s0, 16384, %s22_s27, [#allocation3], %s1718_s29, %s1718_s29, %s1719_s30  }
  0x18   :  { %s1720_s13 = smov [#allocation7]  }
  0x19   :  { %s47_s14 = sshll.u32 %s1720_s13, 4  ;;  %s48_s14 = int_to_ptr.vmem [resolvable:$true] %s47_s14 }
  0x1a   :  { %s1656_s15 = scalar_lea.vmem %s48_s14, 4096  ;;  %p1661_p11 = scmp.lt.s32.totalorder %s48_s14, %s48_s14 }
  0x1b   :  { %p1657_p10 = scmp.ne.s32.totalorder %s48_s14, %s1656_s15  ;;  %p1662_p12 = scmp.lt.s32.totalorder %s1656_s15, %s1656_s15 }
  0x1d   :  { %p1663_p13 = por %p1662_p12, %p1661_p11 }
  0x1f   :  { %p1664_p0 = pnand %p1663_p13, %p1657_p10 }
  0x21   :  { %1667 = shalt.err (!%p1664_p0)
}
  0x22   :  { %s1721_s1 = smov 128   ;;  %s1722_s16 = smov 8  }
  0x23   :  { %53 = dma.hbm_to_vmem [thread:$0]  %s2045_s3, 4096, %s48_s14, [#allocation6], %s1721_s1, %s1721_s1, %s1722_s16  }
  0x24   :  { %s1723_s19 = smov [#allocation8]  }
  0x25   :  { %s61_s20 = sshll.u32 %s1723_s19, 4  ;;  %s62_s20 = int_to_ptr.vmem [resolvable:$true] %s61_s20 }
  0x26   :  { %s1676_s0 = scalar_lea.vmem %s62_s20, 2048  ;;  %p1681_p2 = scmp.lt.s32.totalorder %s62_s20, %s62_s20 }
  0x27   :  { %p1677_p1 = scmp.ne.s32.totalorder %s62_s20, %s1676_s0  ;;  %p1682_p3 = scmp.lt.s32.totalorder %s1676_s0, %s1676_s0 }
  0x29   :  { %p1683_p4 = por %p1682_p3, %p1681_p2 }
  0x2b   :  { %p1684_p5 = pnand %p1683_p4, %p1677_p1 }
  0x2d   :  { %1687 = shalt.err (!%p1684_p5)
}
  0x2e   :  { %67 = dma.hbm_to_vmem [thread:$0]  %s2047_s5, 2048, %s62_s20, [#allocation9], %s1721_s1, %s1721_s1, %s1722_s16  }
  0x2f   :  { %1708 = dma.done.wait [#allocation3], 16384  }
  0x30   :  { %1709 = vsyncadd [#allocation3], 4294950912 }
  0x31   :  { %1710 = dma.done.wait [#allocation6], 12288  }
  0x32   :  { %1711 = vsyncadd [#allocation6], 4294955008 }
  0x33   :  { %1712 = dma.done.wait [#allocation9], 2048  }
  0x34   :  { %1713 = vsyncadd [#allocation9], 4294965248  ;;  %v241_v0 = vld [vmem:[#allocation5 + $0xf8] sm:$0xff]  ;;  %v240_v1 = vld [vmem:[#allocation5 + $0xf0] sm:$0xff]  ;;  %vm1725_vm0 = vmmov 0   ;;  %vm1452_vm1 = vcmask 1041409  }
  0x35   :  { %v239_v2 = vld [vmem:[#allocation5 + $0xe8] sm:$0xff]  ;;  %286 = vmatprep.subr.mxu0 %v241_v0  ;;  %v238_v3 = vld [vmem:[#allocation5 + $0xe0] sm:$0xff]  ;;  %v237_v4 = vld [vmem:[#allocation5 + $0xd8] sm:$0xff]  ;;  %s1726_s25 = smov [#allocation10]  }
  0x36   :  { %287 = vmatpush1.msra.mxu0 %v240_v1  ;;  %v236_v5 = vld [vmem:[#allocation5 + $0xd0] sm:$0xff]  ;;  %v235_v6 = vld [vmem:[#allocation5 + $0xc8] sm:$0xff]  ;;  %v234_v7 = vld [vmem:[#allocation5 + $0xc0] sm:$0xff]  ;;  %s1532_s26 = sshll.u32 %s1726_s25, 4  ;;  %s1533_s26 = int_to_ptr.vmem [resolvable:$true] %s1532_s26 }
  0x37   :  { %288 = vmatprep.subr.mxu0 %v239_v2  ;;  %v233_v8 = vld [vmem:[#allocation5 + $0xb8] sm:$0xff]  ;;  %v232_v9 = vld [vmem:[#allocation5 + $0xb0] sm:$0xff]  ;;  %v231_v10 = vld [vmem:[#allocation5 + $0xa8] sm:$0xff]  ;;  %s1688_s27 = scalar_lea.vmem %s1533_s26, 32  ;;  %p1693_p7 = scmp.lt.s32.totalorder %s1533_s26, %s1533_s26 }
  0x38   :  { %289 = vmatpush1.msra.mxu0 %v238_v3  ;;  %v230_v11 = vld [vmem:[#allocation5 + $0xa0] sm:$0xff]  ;;  %v229_v12 = vld [vmem:[#allocation5 + $0x98] sm:$0xff]  ;;  %v228_v13 = vld [vmem:[#allocation5 + $0x90] sm:$0xff]  ;;  %p1689_p6 = scmp.ne.s32.totalorder %s1533_s26, %s1688_s27  ;;  %p1694_p8 = scmp.lt.s32.totalorder %s1688_s27, %s1688_s27 }
  0x39   :  { %290 = vmatprep.subr.mxu0 %v237_v4  ;;  %v227_v14 = vld [vmem:[#allocation5 + $0x88] sm:$0xff]  ;;  %v226_v15 = vld [vmem:[#allocation5 + $0x80] sm:$0xff]  ;;  %v225_v16 = vld [vmem:[#allocation5 + $0x78] sm:$0xff] }
  0x3a   :  { %291 = vmatpush1.msra.mxu0 %v236_v5  ;;  %v224_v17 = vld [vmem:[#allocation5 + $0x70] sm:$0xff]  ;;  %v223_v18 = vld [vmem:[#allocation5 + $0x68] sm:$0xff]  ;;  %v222_v19 = vld [vmem:[#allocation5 + $0x60] sm:$0xff]  ;;  %p1695_p9 = por %p1694_p8, %p1693_p7 }
  0x3b   :  { %292 = vmatprep.subr.mxu0 %v235_v6  ;;  %v221_v20 = vld [vmem:[#allocation5 + $0x58] sm:$0xff]  ;;  %v220_v21 = vld [vmem:[#allocation5 + $0x50] sm:$0xff]  ;;  %v219_v22 = vld [vmem:[#allocation5 + $0x48] sm:$0xff] }
  0x3c   :  { %293 = vmatpush1.msra.mxu0 %v234_v7  ;;  %v218_v23 = vld [vmem:[#allocation5 + $0x40] sm:$0xff]  ;;  %v83_v24 = vld [vmem:[#allocation2 + $0x8] sm:$0xff]  ;;  %v217_v25 = vld [vmem:[#allocation5 + $0x38] sm:$0xff]  ;;  %v1724_v7 = vmov 0.0   ;;  %p1696_p10 = pnand %p1695_p9, %p1689_p6 }
  0x3d   :  { %294 = vmatprep.subr.mxu0 %v233_v8  ;;  %350 = vmatprep.mubr.f32.mxu0 %v83_v24  ;;  %v216_v26 = vld [vmem:[#allocation5 + $0x30] sm:$0xff]  ;;  %v215_v27 = vld [vmem:[#allocation5 + $0x28] sm:$0xff]  ;;  %v214_v28 = vld [vmem:[#allocation5 + $0x20] sm:$0xff] }
  0x3e   :  { %295 = vmatpush1.msra.mxu0 %v232_v9  ;;  %v213_v29 = vld [vmem:[#allocation5 + $0x18] sm:$0xff]  ;;  %v212_v30 = vld [vmem:[#allocation5 + $0x10] sm:$0xff]  ;;  %v211_v31 = vld [vmem:[#allocation5 + $0x8] sm:$0xff]  ;;  %902 = vmatprep.subr.mxu1 %v1724_v7 }
  0x3f   :  { %296 = vmatprep.subr.mxu0 %v231_v10  ;;  %v210_v32 = vld [vmem:[#allocation5] sm:$0xff]  ;;  %v273_v33 = vld [vmem:[#allocation5 + $0x1f8] sm:$0xff]  ;;  %v272_v34 = vld [vmem:[#allocation5 + $0x1f0] sm:$0xff] }
  0x40   :  { %297 = vmatpush1.msra.mxu0 %v230_v11  ;;  %v271_v35 = vld [vmem:[#allocation5 + $0x1e8] sm:$0xff]  ;;  %v270_v36 = vld [vmem:[#allocation5 + $0x1e0] sm:$0xff]  ;;  %v269_v37 = vld [vmem:[#allocation5 + $0x1d8] sm:$0xff] }
  0x41   :  { %298 = vmatprep.subr.mxu0 %v229_v12  ;;  %v268_v38 = vld [vmem:[#allocation5 + $0x1d0] sm:$0xff]  ;;  %v267_v39 = vld [vmem:[#allocation5 + $0x1c8] sm:$0xff]  ;;  %v266_v40 = vld [vmem:[#allocation5 + $0x1c0] sm:$0xff] }
  0x42   :  { %299 = vmatpush1.msra.mxu0 %v228_v13  ;;  %v265_v41 = vld [vmem:[#allocation5 + $0x1b8] sm:$0xff]  ;;  %v264_v42 = vld [vmem:[#allocation5 + $0x1b0] sm:$0xff]  ;;  %v263_v43 = vld [vmem:[#allocation5 + $0x1a8] sm:$0xff] }
  0x43   :  { %300 = vmatprep.subr.mxu0 %v227_v14  ;;  %v262_v44 = vld [vmem:[#allocation5 + $0x1a0] sm:$0xff]  ;;  %v261_v45 = vld [vmem:[#allocation5 + $0x198] sm:$0xff]  ;;  %v260_v46 = vld [vmem:[#allocation5 + $0x190] sm:$0xff] }
  0x44   :  { %301 = vmatpush1.msra.mxu0 %v226_v15  ;;  %v259_v47 = vld [vmem:[#allocation5 + $0x188] sm:$0xff]  ;;  %v258_v48 = vld [vmem:[#allocation5 + $0x180] sm:$0xff]  ;;  %v257_v49 = vld [vmem:[#allocation5 + $0x178] sm:$0xff] }
  0x45   :  { %302 = vmatprep.subr.mxu0 %v225_v16  ;;  %v256_v50 = vld [vmem:[#allocation5 + $0x170] sm:$0xff]  ;;  %v255_v51 = vld [vmem:[#allocation5 + $0x168] sm:$0xff]  ;;  %v254_v52 = vld [vmem:[#allocation5 + $0x160] sm:$0xff] }
  0x46   :  { %303 = vmatpush1.msra.mxu0 %v224_v17  ;;  %v253_v53 = vld [vmem:[#allocation5 + $0x158] sm:$0xff]  ;;  %v252_v54 = vld [vmem:[#allocation5 + $0x150] sm:$0xff]  ;;  %v251_v55 = vld [vmem:[#allocation5 + $0x148] sm:$0xff] }
  0x47   :  { %304 = vmatprep.subr.mxu0 %v223_v18  ;;  %v250_v56 = vld [vmem:[#allocation5 + $0x140] sm:$0xff]  ;;  %v249_v57 = vld [vmem:[#allocation5 + $0x138] sm:$0xff]  ;;  %v248_v58 = vld [vmem:[#allocation5 + $0x130] sm:$0xff] }
  0x48   :  { %305 = vmatpush1.msra.mxu0 %v222_v19  ;;  %v247_v59 = vld [vmem:[#allocation5 + $0x128] sm:$0xff]  ;;  %v246_v60 = vld [vmem:[#allocation5 + $0x120] sm:$0xff]  ;;  %v245_v61 = vld [vmem:[#allocation5 + $0x118] sm:$0xff] }
  0x49   :  { %306 = vmatprep.subr.mxu0 %v221_v20  ;;  %v244_v62 = vld [vmem:[#allocation5 + $0x110] sm:$0xff]  ;;  %v243_v63 = vld [vmem:[#allocation5 + $0x108] sm:$0xff]  ;;  %v242_v0 = vld [vmem:[#allocation5 + $0x100] sm:$0xff] }
  0x4a   :  { %307 = vmatpush1.msra.mxu0 %v220_v21  ;;  %v82_v1 = vld [vmem:[#allocation2] sm:$0xff]  ;;  %v85_v2 = vld [vmem:[#allocation2 + $0x18] sm:$0xff]  ;;  %v84_v3 = vld [vmem:[#allocation2 + $0x10] sm:$0xff] }
  0x4b   :  { %308 = vmatprep.subr.mxu0 %v219_v22  ;;  %v87_v4 = vld [vmem:[#allocation2 + $0x28] sm:$0xff]  ;;  %v86_v5 = vld [vmem:[#allocation2 + $0x20] sm:$0xff]  ;;  %v89_v6 = vld [vmem:[#allocation2 + $0x38] sm:$0xff] }
  0x4c   :  { %309 = vmatpush1.msra.mxu0 %v218_v23  ;;  %v878_v8 = vld [vmem:[#allocation7 + $0x78] sm:$0xff]  ;;  %v88_v9 = vld [vmem:[#allocation2 + $0x30] sm:$0xff]  ;;  %v91_v11 = vld [vmem:[#allocation2 + $0x48] sm:$0xff] }
  0x4d   :  { %310 = vmatprep.subr.mxu0 %v217_v25  ;;  %903 = vmatpush1.msra.mxu1 %v878_v8  ;;  %v877_v10 = vld [vmem:[#allocation7 + $0x70] sm:$0xff]  ;;  %v876_v12 = vld [vmem:[#allocation7 + $0x68] sm:$0xff]  ;;  %v90_v13 = vld [vmem:[#allocation2 + $0x40] sm:$0xff] }
  0x4e   :  { %311 = vmatpush1.msra.mxu0 %v216_v26  ;;  %904 = vmatprep.subr.mxu1 %v1724_v7  ;;  %v875_v14 = vld [vmem:[#allocation7 + $0x60] sm:$0xff]  ;;  %v93_v15 = vld [vmem:[#allocation2 + $0x58] sm:$0xff]  ;;  %v92_v17 = vld [vmem:[#allocation2 + $0x50] sm:$0xff] }
  0x4f   :  { %312 = vmatprep.subr.mxu0 %v215_v27  ;;  %905 = vmatpush1.msra.mxu1 %v877_v10  ;;  %v874_v16 = vld [vmem:[#allocation7 + $0x58] sm:$0xff]  ;;  %v873_v18 = vld [vmem:[#allocation7 + $0x50] sm:$0xff]  ;;  %v95_v19 = vld [vmem:[#allocation2 + $0x68] sm:$0xff] }
  0x50   :  { %313 = vmatpush1.msra.mxu0 %v214_v28  ;;  %906 = vmatprep.subr.mxu1 %v1724_v7  ;;  %v872_v20 = vld [vmem:[#allocation7 + $0x48] sm:$0xff]  ;;  %v94_v21 = vld [vmem:[#allocation2 + $0x60] sm:$0xff]  ;;  %v97_v23 = vld [vmem:[#allocation2 + $0x78] sm:$0xff] }
  0x51   :  { %314 = vmatprep.subr.mxu0 %v213_v29  ;;  %907 = vmatpush1.msra.mxu1 %v876_v12  ;;  %v871_v22 = vld [vmem:[#allocation7 + $0x40] sm:$0xff]  ;;  %v870_v24 = vld [vmem:[#allocation7 + $0x38] sm:$0xff]  ;;  %v96_v25 = vld [vmem:[#allocation2 + $0x70] sm:$0xff] }
  0x52   :  { %315 = vmatpush1.msra.mxu0 %v212_v30  ;;  %908 = vmatprep.subr.mxu1 %v1724_v7  ;;  %v869_v26 = vld [vmem:[#allocation7 + $0x30] sm:$0xff]  ;;  %v99_v27 = vld [vmem:[#allocation2 + $0x88] sm:$0xff]  ;;  %v98_v29 = vld [vmem:[#allocation2 + $0x80] sm:$0xff] }
  0x53   :  { %316 = vmatprep.subr.mxu0 %v211_v31  ;;  %909 = vmatpush1.msra.mxu1 %v875_v14  ;;  %v868_v28 = vld [vmem:[#allocation7 + $0x28] sm:$0xff]  ;;  %v867_v30 = vld [vmem:[#allocation7 + $0x20] sm:$0xff]  ;;  %v101_v31 = vld [vmem:[#allocation2 + $0x98] sm:$0xff] }
  0x54   :  { %317 = vmatpush1.msra.mxu0 %v210_v32  ;;  %910 = vmatprep.subr.mxu1 %v1724_v7  ;;  %v866_v32 = vld [vmem:[#allocation7 + $0x18] sm:$0xff]  ;;  %v879_v8 = vld [vmem:[#allocation7 + $0x80] sm:$0xff]  ;;  %v123_v10 = vld [vmem:[#allocation2 + $0x148] sm:$0xff] }
  0x55   :  { %318 = vmatprep.subr.mxu0 %v273_v33  ;;  %911 = vmatpush1.msra.mxu1 %v874_v16  ;;  %v100_v33 = vld [vmem:[#allocation2 + $0x90] sm:$0xff]  ;;  %v125_v12 = vld [vmem:[#allocation2 + $0x158] sm:$0xff]  ;;  %v127_v14 = vld [vmem:[#allocation2 + $0x168] sm:$0xff] }
  0x56   :  { %319 = vmatpush2.msra.mxu0 %v272_v34  ;;  %912 = vmatprep.subr.mxu1 %v1724_v7  ;;  %v865_v34 = vld [vmem:[#allocation7 + $0x10] sm:$0xff]  ;;  %v129_v16 = vld [vmem:[#allocation2 + $0x178] sm:$0xff] }
  0x57   :  { %320 = vmatprep.subr.mxu0 %v271_v35  ;;  %913 = vmatpush1.msra.mxu1 %v873_v18  ;;  %v103_v35 = vld [vmem:[#allocation2 + $0xa8] sm:$0xff] }
  0x58   :  { %321 = vmatpush2.msra.mxu0 %v270_v36  ;;  %914 = vmatprep.subr.mxu1 %v1724_v7  ;;  %v864_v36 = vld [vmem:[#allocation7 + $0x8] sm:$0xff] }
  0x59   :  { %322 = vmatprep.subr.mxu0 %v269_v37  ;;  %915 = vmatpush1.msra.mxu1 %v872_v20  ;;  %v102_v37 = vld [vmem:[#allocation2 + $0xa0] sm:$0xff]  ;;  %v131_v18 = vld [vmem:[#allocation2 + $0x188] sm:$0xff]  ;;  %v133_v20 = vld [vmem:[#allocation2 + $0x198] sm:$0xff] }
  0x5a   :  { %323 = vmatpush2.msra.mxu0 %v268_v38  ;;  %916 = vmatprep.subr.mxu1 %v1724_v7  ;;  %v863_v38 = vld [vmem:[#allocation7] sm:$0xff] }
  0x5b   :  { %324 = vmatprep.subr.mxu0 %v267_v39  ;;  %917 = vmatpush1.msra.mxu1 %v871_v22  ;;  %v105_v39 = vld [vmem:[#allocation2 + $0xb8] sm:$0xff]  ;;  %v135_v22 = vld [vmem:[#allocation2 + $0x1a8] sm:$0xff] }
  0x5c   :  { %325 = vmatpush2.msra.mxu0 %v266_v40  ;;  %918 = vmatprep.subr.mxu1 %v1724_v7  ;;  %v894_v40 = vld [vmem:[#allocation7 + $0xf8] sm:$0xff] }
  0x5d   :  { %326 = vmatprep.subr.mxu0 %v265_v41  ;;  %919 = vmatpush1.msra.mxu1 %v870_v24  ;;  %v104_v41 = vld [vmem:[#allocation2 + $0xb0] sm:$0xff]  ;;  %v137_v24 = vld [vmem:[#allocation2 + $0x1b8] sm:$0xff] }
  0x5e   :  { %327 = vmatpush2.msra.mxu0 %v264_v42  ;;  %920 = vmatprep.subr.mxu1 %v1724_v7  ;;  %v893_v42 = vld [vmem:[#allocation7 + $0xf0] sm:$0xff] }
  0x5f   :  { %328 = vmatprep.subr.mxu0 %v263_v43  ;;  %921 = vmatpush1.msra.mxu1 %v869_v26  ;;  %v107_v43 = vld [vmem:[#allocation2 + $0xc8] sm:$0xff] }
  0x60   :  { %329 = vmatpush2.msra.mxu0 %v262_v44  ;;  %922 = vmatprep.subr.mxu1 %v1724_v7  ;;  %v892_v44 = vld [vmem:[#allocation7 + $0xe8] sm:$0xff] }
  0x61   :  { %330 = vmatprep.subr.mxu0 %v261_v45  ;;  %923 = vmatpush1.msra.mxu1 %v868_v28  ;;  %v106_v45 = vld [vmem:[#allocation2 + $0xc0] sm:$0xff]  ;;  %v139_v26 = vld [vmem:[#allocation2 + $0x1c8] sm:$0xff]  ;;  %v141_v28 = vld [vmem:[#allocation2 + $0x1d8] sm:$0xff] }
  0x62   :  { %331 = vmatpush2.msra.mxu0 %v260_v46  ;;  %924 = vmatprep.subr.mxu1 %v1724_v7  ;;  %v891_v46 = vld [vmem:[#allocation7 + $0xe0] sm:$0xff] }
  0x63   :  { %332 = vmatprep.subr.mxu0 %v259_v47  ;;  %925 = vmatpush1.msra.mxu1 %v867_v30  ;;  %v109_v47 = vld [vmem:[#allocation2 + $0xd8] sm:$0xff]  ;;  %v143_v30 = vld [vmem:[#allocation2 + $0x1e8] sm:$0xff] }
  0x64   :  { %333 = vmatpush2.msra.mxu0 %v258_v48  ;;  %926 = vmatprep.subr.mxu1 %v1724_v7  ;;  %v890_v48 = vld [vmem:[#allocation7 + $0xd8] sm:$0xff] }
  0x65   :  { %334 = vmatprep.subr.mxu0 %v257_v49  ;;  %927 = vmatpush1.msra.mxu1 %v866_v32  ;;  %v108_v49 = vld [vmem:[#allocation2 + $0xd0] sm:$0xff]  ;;  %v145_v32 = vld [vmem:[#allocation2 + $0x1f8] sm:$0xff] }
  0x66   :  { %335 = vmatpush2.msra.mxu0 %v256_v50  ;;  %928 = vmatprep.subr.mxu1 %v1724_v7  ;;  %v889_v50 = vld [vmem:[#allocation7 + $0xd0] sm:$0xff] }
  0x67   :  { %336 = vmatprep.subr.mxu0 %v255_v51  ;;  %929 = vmatpush1.msra.mxu1 %v865_v34  ;;  %v111_v51 = vld [vmem:[#allocation2 + $0xe8] sm:$0xff] }
  0x68   :  { %337 = vmatpush2.msra.mxu0 %v254_v52  ;;  %930 = vmatprep.subr.mxu1 %v1724_v7  ;;  %v888_v52 = vld [vmem:[#allocation7 + $0xc8] sm:$0xff] }
  0x69   :  { %338 = vmatprep.subr.mxu0 %v253_v53  ;;  %931 = vmatpush1.msra.mxu1 %v864_v36  ;;  %v110_v53 = vld [vmem:[#allocation2 + $0xe0] sm:$0xff]  ;;  %v147_v34 = vld [vmem:[#allocation2 + $0x208] sm:$0xff]  ;;  %v149_v36 = vld [vmem:[#allocation2 + $0x218] sm:$0xff] }
  0x6a   :  { %339 = vmatpush2.msra.mxu0 %v252_v54  ;;  %932 = vmatprep.subr.mxu1 %v1724_v7  ;;  %v887_v54 = vld [vmem:[#allocation7 + $0xc0] sm:$0xff] }
  0x6b   :  { %340 = vmatprep.subr.mxu0 %v251_v55  ;;  %933 = vmatpush1.msra.mxu1 %v863_v38  ;;  %v113_v55 = vld [vmem:[#allocation2 + $0xf8] sm:$0xff]  ;;  %v151_v38 = vld [vmem:[#allocation2 + $0x228] sm:$0xff] }
  0x6c   :  { %341 = vmatpush2.msra.mxu0 %v250_v56  ;;  %934 = vmatprep.subr.mxu1 %v1724_v7  ;;  %v886_v56 = vld [vmem:[#allocation7 + $0xb8] sm:$0xff] }
  0x6d   :  { %342 = vmatprep.subr.mxu0 %v249_v57  ;;  %935 = vmatpush2.msra.mxu1 %v894_v40  ;;  %v112_v57 = vld [vmem:[#allocation2 + $0xf0] sm:$0xff]  ;;  %v153_v40 = vld [vmem:[#allocation2 + $0x238] sm:$0xff] }
  0x6e   :  { %343 = vmatpush2.msra.mxu0 %v248_v58  ;;  %936 = vmatprep.subr.mxu1 %v1724_v7  ;;  %v885_v58 = vld [vmem:[#allocation7 + $0xb0] sm:$0xff] }
  0x6f   :  { %344 = vmatprep.subr.mxu0 %v247_v59  ;;  %937 = vmatpush2.msra.mxu1 %v893_v42  ;;  %v115_v59 = vld [vmem:[#allocation2 + $0x108] sm:$0xff] }
  0x70   :  { %345 = vmatpush2.msra.mxu0 %v246_v60  ;;  %938 = vmatprep.subr.mxu1 %v1724_v7  ;;  %v884_v60 = vld [vmem:[#allocation7 + $0xa8] sm:$0xff] }
  0x71   :  { %346 = vmatprep.subr.mxu0 %v245_v61  ;;  %939 = vmatpush2.msra.mxu1 %v892_v44  ;;  %v114_v61 = vld [vmem:[#allocation2 + $0x100] sm:$0xff]  ;;  %v155_v42 = vld [vmem:[#allocation2 + $0x248] sm:$0xff]  ;;  %v157_v44 = vld [vmem:[#allocation2 + $0x258] sm:$0xff] }
  0x72   :  { %347 = vmatpush2.msra.mxu0 %v244_v62  ;;  %940 = vmatprep.subr.mxu1 %v1724_v7  ;;  %v883_v62 = vld [vmem:[#allocation7 + $0xa0] sm:$0xff] }
  0x73   :  { %348 = vmatprep.subr.mxu0 %v243_v63  ;;  %941 = vmatpush2.msra.mxu1 %v891_v46  ;;  %v117_v63 = vld [vmem:[#allocation2 + $0x118] sm:$0xff]  ;;  %v159_v46 = vld [vmem:[#allocation2 + $0x268] sm:$0xff] }
  0x74   :  { %349 = vmatpush2.msra.mxu0 %v242_v0  ;;  %942 = vmatprep.subr.mxu1 %v1724_v7  ;;  %v882_v0 = vld [vmem:[#allocation7 + $0x98] sm:$0xff] }
  0x75   :  { %351 = vmatmul.mubr.f32.vlgmr.msra.gmra.mxu0 %v82_v1  ;;  %1562 = vmatprep.subr.mxu0 %v1724_v7  ;;  %v116_v1 = vld [vmem:[#allocation2 + $0x110] sm:$0xff] }
  0x76   :  { %356 = vmatprep.mubr.f32.mxu0 %v85_v2  ;;  %943 = vmatpush2.msra.mxu1 %v890_v48  ;;  %v119_v2 = vld [vmem:[#allocation2 + $0x128] sm:$0xff]  ;;  %v161_v48 = vld [vmem:[#allocation2 + $0x278] sm:$0xff] }
  0x77   :  { %944 = vmatprep.subr.mxu1 %v1724_v7 }
  0x78   :  { %945 = vmatpush2.msra.mxu1 %v889_v50  ;;  %v163_v50 = vld [vmem:[#allocation2 + $0x288] sm:$0xff] }
  0x79   :  { %357 = vmatmul.mubr.f32.gmra.mxu0 %v84_v3  ;;  %946 = vmatprep.subr.mxu1 %v1724_v7  ;;  %v881_v3 = vld [vmem:[#allocation7 + $0x90] sm:$0xff] }
  0x7a   :  { %362 = vmatprep.mubr.f32.mxu0 %v87_v4  ;;  %947 = vmatpush2.msra.mxu1 %v888_v52  ;;  %v880_v4 = vld [vmem:[#allocation7 + $0x88] sm:$0xff]  ;;  %v165_v52 = vld [vmem:[#allocation2 + $0x298] sm:$0xff] }
  0x7b   :  { %948 = vmatprep.subr.mxu1 %v1724_v7 }
  0x7c   :  { %949 = vmatpush2.msra.mxu1 %v887_v54  ;;  %v167_v54 = vld [vmem:[#allocation2 + $0x2a8] sm:$0xff] }
  0x7d   :  { %363 = vmatmul.mubr.f32.gmra.mxu0 %v86_v5  ;;  %950 = vmatprep.subr.mxu1 %v1724_v7  ;;  %v118_v5 = vld [vmem:[#allocation2 + $0x120] sm:$0xff] }
  0x7e   :  { %368 = vmatprep.mubr.f32.mxu0 %v89_v6  ;;  %951 = vmatpush2.msra.mxu1 %v886_v56  ;;  %v121_v6 = vld [vmem:[#allocation2 + $0x138] sm:$0xff] }
  0x7f   :  { %952 = vmatprep.subr.mxu1 %v1724_v7  ;;  %v169_v56 = vld [vmem:[#allocation2 + $0x2b8] sm:$0xff] }
  0x80   :  { %953 = vmatpush2.msra.mxu1 %v885_v58  ;;  %v171_v58 = vld [vmem:[#allocation2 + $0x2c8] sm:$0xff] }
  0x81   :  { %369 = vmatmul.mubr.f32.gmra.mxu0 %v88_v9  ;;  %954 = vmatprep.subr.mxu1 %v1724_v7  ;;  %v120_v9 = vld [vmem:[#allocation2 + $0x130] sm:$0xff] }
  0x82   :  { %374 = vmatprep.mubr.f32.mxu0 %v91_v11  ;;  %955 = vmatpush2.msra.mxu1 %v884_v60  ;;  %v122_v11 = vld [vmem:[#allocation2 + $0x140] sm:$0xff]  ;;  %v173_v60 = vld [vmem:[#allocation2 + $0x2d8] sm:$0xff] }
  0x83   :  { %956 = vmatprep.subr.mxu1 %v1724_v7 }
  0x84   :  { %957 = vmatpush2.msra.mxu1 %v883_v62  ;;  %v175_v62 = vld [vmem:[#allocation2 + $0x2e8] sm:$0xff] }
  0x85   :  { %375 = vmatmul.mubr.f32.gmra.mxu0 %v90_v13  ;;  %958 = vmatprep.subr.mxu1 %v1724_v7  ;;  %v124_v13 = vld [vmem:[#allocation2 + $0x150] sm:$0xff] }
  0x86   :  { %380 = vmatprep.mubr.f32.mxu0 %v93_v15  ;;  %959 = vmatpush2.msra.mxu1 %v882_v0  ;;  %v126_v15 = vld [vmem:[#allocation2 + $0x160] sm:$0xff] }
  0x87   :  { %960 = vmatprep.subr.mxu1 %v1724_v7  ;;  %v174_v0 = vld [vmem:[#allocation2 + $0x2e0] sm:$0xff] }
  0x88   :  { %961 = vmatpush2.msra.mxu1 %v881_v3  ;;  %v176_v3 = vld [vmem:[#allocation2 + $0x2f0] sm:$0xff] }
  0x89   :  { %381 = vmatmul.mubr.f32.gmra.mxu0 %v92_v17  ;;  %962 = vmatprep.subr.mxu1 %v1724_v7  ;;  %v128_v17 = vld [vmem:[#allocation2 + $0x170] sm:$0xff] }
  0x8a   :  { %386 = vmatprep.mubr.f32.mxu0 %v95_v19  ;;  %963 = vmatpush2.msra.mxu1 %v880_v4  ;;  %v130_v19 = vld [vmem:[#allocation2 + $0x180] sm:$0xff]  ;;  %v179_v4 = vld [vmem:[#allocation2 + $0x308] sm:$0xff] }
  0x8b   :  { %964 = vmatprep.subr.mxu1 %v1724_v7 }
  0x8c   :  { %965 = vmatpush2.msra.mxu1 %v879_v8 }
  0x8d   :  { %387 = vmatmul.mubr.f32.gmra.mxu0 %v94_v21  ;;  %v132_v21 = vld [vmem:[#allocation2 + $0x190] sm:$0xff] }
  0x8e   :  { %392 = vmatprep.mubr.f32.mxu0 %v97_v23  ;;  %v134_v23 = vld [vmem:[#allocation2 + $0x1a0] sm:$0xff] }
  0x91   :  { %393 = vmatmul.mubr.f32.gmra.mxu0 %v96_v25  ;;  %v136_v25 = vld [vmem:[#allocation2 + $0x1b0] sm:$0xff] }
  0x92   :  { %398 = vmatprep.mubr.f32.mxu0 %v99_v27  ;;  %v138_v27 = vld [vmem:[#allocation2 + $0x1c0] sm:$0xff] }
  0x95   :  { %399 = vmatmul.mubr.f32.gmra.mxu0 %v98_v29  ;;  %v140_v29 = vld [vmem:[#allocation2 + $0x1d0] sm:$0xff] }
  0x96   :  { %404 = vmatprep.mubr.f32.mxu0 %v101_v31  ;;  %v142_v31 = vld [vmem:[#allocation2 + $0x1e0] sm:$0xff] }
  0x99   :  { %405 = vmatmul.mubr.f32.gmra.mxu0 %v100_v33  ;;  %v144_v33 = vld [vmem:[#allocation2 + $0x1f0] sm:$0xff] }
  0x9a   :  { %410 = vmatprep.mubr.f32.mxu0 %v103_v35  ;;  %v146_v35 = vld [vmem:[#allocation2 + $0x200] sm:$0xff] }
  0x9d   :  { %411 = vmatmul.mubr.f32.gmra.mxu0 %v102_v37  ;;  %v148_v37 = vld [vmem:[#allocation2 + $0x210] sm:$0xff] }
  0x9e   :  { %416 = vmatprep.mubr.f32.mxu0 %v105_v39  ;;  %v150_v39 = vld [vmem:[#allocation2 + $0x220] sm:$0xff] }
  0xa1   :  { %417 = vmatmul.mubr.f32.gmra.mxu0 %v104_v41  ;;  %v152_v41 = vld [vmem:[#allocation2 + $0x230] sm:$0xff] }
  0xa2   :  { %422 = vmatprep.mubr.f32.mxu0 %v107_v43  ;;  %v154_v43 = vld [vmem:[#allocation2 + $0x240] sm:$0xff] }
  0xa5   :  { %423 = vmatmul.mubr.f32.gmra.mxu0 %v106_v45  ;;  %v156_v45 = vld [vmem:[#allocation2 + $0x250] sm:$0xff] }
  0xa6   :  { %428 = vmatprep.mubr.f32.mxu0 %v109_v47  ;;  %v158_v47 = vld [vmem:[#allocation2 + $0x260] sm:$0xff] }
  0xa9   :  { %429 = vmatmul.mubr.f32.gmra.mxu0 %v108_v49  ;;  %v160_v49 = vld [vmem:[#allocation2 + $0x270] sm:$0xff] }
  0xaa   :  { %434 = vmatprep.mubr.f32.mxu0 %v111_v51  ;;  %v162_v51 = vld [vmem:[#allocation2 + $0x280] sm:$0xff] }
  0xad   :  { %435 = vmatmul.mubr.f32.gmra.mxu0 %v110_v53  ;;  %v164_v53 = vld [vmem:[#allocation2 + $0x290] sm:$0xff] }
  0xae   :  { %440 = vmatprep.mubr.f32.mxu0 %v113_v55  ;;  %v166_v55 = vld [vmem:[#allocation2 + $0x2a0] sm:$0xff] }
  0xb1   :  { %441 = vmatmul.mubr.f32.gmra.mxu0 %v112_v57  ;;  %v168_v57 = vld [vmem:[#allocation2 + $0x2b0] sm:$0xff] }
  0xb2   :  { %446 = vmatprep.mubr.f32.mxu0 %v115_v59  ;;  %v170_v59 = vld [vmem:[#allocation2 + $0x2c0] sm:$0xff] }
  0xb5   :  { %447 = vmatmul.mubr.f32.gmra.mxu0 %v114_v61  ;;  %v172_v61 = vld [vmem:[#allocation2 + $0x2d0] sm:$0xff] }
  0xb6   :  { %452 = vmatprep.mubr.f32.mxu0 %v117_v63  ;;  %v276_v63 = vlaneseq }
  0xb9   :  { %453 = vmatmul.mubr.f32.gmra.mxu0 %v116_v1  ;;  %v177_v1 = vld [vmem:[#allocation2 + $0x2f8] sm:$0xff] }
  0xba   :  { %458 = vmatprep.mubr.f32.mxu0 %v119_v2  ;;  %v277_v2 = vshrl.u32 %v276_v63, 7 }
  0xbc   :  { %v282_v8 = vsub.s32 1, %v277_v2 }
  0xbd   :  { %459 = vmatmul.mubr.f32.gmra.mxu0 %v118_v5  ;;  %v278_v5 = vsub.s32 0, %v277_v2 }
  0xbe   :  { %464 = vmatprep.mubr.f32.mxu0 %v121_v6  ;;  %v274_v6 = vld [vmem:[%s2044_s2] sm:$0x3] }
  0xc1   :  { %465 = vmatmul.mubr.f32.gmra.mxu0 %v120_v9  ;;  %v178_v9 = vld [vmem:[#allocation2 + $0x300] sm:$0xff] }
  0xc2   :  { %470 = vmatprep.mubr.f32.mxu0 %v123_v10  ;;  %v1815_v10 = vrot.slane %v274_v6, %v278_v5  ;;  %v194_v5 = vld [vmem:[#allocation2 + $0x380] sm:$0xff] }
  0xc5   :  { %471 = vmatmul.mubr.f32.gmra.mxu0 %v122_v11  ;;  %v181_v11 = vld [vmem:[#allocation2 + $0x318] sm:$0xff] }
  0xc6   :  { %476 = vmatprep.mubr.f32.mxu0 %v125_v12  ;;  %v1817_v12 = vrot.slane %v274_v6, %v282_v8 }
  0xc9   :  { %477 = vmatmul.mubr.f32.gmra.mxu0 %v124_v13 }
  0xca   :  { %482 = vmatprep.mubr.f32.mxu0 %v127_v14  ;;  %v180_v14 = vld [vmem:[#allocation2 + $0x310] sm:$0xff] }
  0xcd   :  { %483 = vmatmul.mubr.f32.gmra.mxu0 %v126_v15 }
  0xce   :  { %488 = vmatprep.mubr.f32.mxu0 %v129_v16 }
  0xd1   :  { %489 = vmatmul.mubr.f32.gmra.mxu0 %v128_v17  ;;  %v183_v17 = vld [vmem:[#allocation2 + $0x328] sm:$0xff] }
  0xd2   :  { %494 = vmatprep.mubr.f32.mxu0 %v131_v18 }
  0xd5   :  { %495 = vmatmul.mubr.f32.gmra.mxu0 %v130_v19 }
  0xd6   :  { %500 = vmatprep.mubr.f32.mxu0 %v133_v20 }
  0xd9   :  { %501 = vmatmul.mubr.f32.gmra.mxu0 %v132_v21  ;;  %v182_v21 = vld [vmem:[#allocation2 + $0x320] sm:$0xff] }
  0xda   :  { %506 = vmatprep.mubr.f32.mxu0 %v135_v22 }
  0xdd   :  { %507 = vmatmul.mubr.f32.gmra.mxu0 %v134_v23 }
  0xde   :  { %512 = vmatprep.mubr.f32.mxu0 %v137_v24 }
  0xe1   :  { %513 = vmatmul.mubr.f32.gmra.mxu0 %v136_v25  ;;  %v185_v25 = vld [vmem:[#allocation2 + $0x338] sm:$0xff] }
  0xe2   :  { %518 = vmatprep.mubr.f32.mxu0 %v139_v26 }
  0xe5   :  { %519 = vmatmul.mubr.f32.gmra.mxu0 %v138_v27 }
  0xe6   :  { %524 = vmatprep.mubr.f32.mxu0 %v141_v28 }
  0xe9   :  { %525 = vmatmul.mubr.f32.gmra.mxu0 %v140_v29  ;;  %v184_v29 = vld [vmem:[#allocation2 + $0x330] sm:$0xff] }
  0xea   :  { %530 = vmatprep.mubr.f32.mxu0 %v143_v30 }
  0xed   :  { %531 = vmatmul.mubr.f32.gmra.mxu0 %v142_v31 }
  0xee   :  { %536 = vmatprep.mubr.f32.mxu0 %v145_v32 }
  0xf1   :  { %537 = vmatmul.mubr.f32.gmra.mxu0 %v144_v33  ;;  %v187_v33 = vld [vmem:[#allocation2 + $0x348] sm:$0xff] }
  0xf2   :  { %542 = vmatprep.mubr.f32.mxu0 %v147_v34 }
  0xf5   :  { %543 = vmatmul.mubr.f32.gmra.mxu0 %v146_v35 }
  0xf6   :  { %548 = vmatprep.mubr.f32.mxu0 %v149_v36 }
  0xf9   :  { %549 = vmatmul.mubr.f32.gmra.mxu0 %v148_v37  ;;  %v186_v37 = vld [vmem:[#allocation2 + $0x340] sm:$0xff] }
  0xfa   :  { %554 = vmatprep.mubr.f32.mxu0 %v151_v38 }
  0xfd   :  { %555 = vmatmul.mubr.f32.gmra.mxu0 %v150_v39 }
  0xfe   :  { %560 = vmatprep.mubr.f32.mxu0 %v153_v40 }
 0x101   :  { %561 = vmatmul.mubr.f32.gmra.mxu0 %v152_v41  ;;  %v189_v41 = vld [vmem:[#allocation2 + $0x358] sm:$0xff] }
 0x102   :  { %566 = vmatprep.mubr.f32.mxu0 %v155_v42 }
 0x105   :  { %567 = vmatmul.mubr.f32.gmra.mxu0 %v154_v43 }
 0x106   :  { %572 = vmatprep.mubr.f32.mxu0 %v157_v44 }
 0x109   :  { %573 = vmatmul.mubr.f32.gmra.mxu0 %v156_v45  ;;  %v188_v45 = vld [vmem:[#allocation2 + $0x350] sm:$0xff] }
 0x10a   :  { %578 = vmatprep.mubr.f32.mxu0 %v159_v46 }
 0x10d   :  { %579 = vmatmul.mubr.f32.gmra.mxu0 %v158_v47 }
 0x10e   :  { %584 = vmatprep.mubr.f32.mxu0 %v161_v48 }
 0x111   :  { %585 = vmatmul.mubr.f32.gmra.mxu0 %v160_v49  ;;  %v191_v49 = vld [vmem:[#allocation2 + $0x368] sm:$0xff] }
 0x112   :  { %590 = vmatprep.mubr.f32.mxu0 %v163_v50 }
 0x115   :  { %591 = vmatmul.mubr.f32.gmra.mxu0 %v162_v51 }
 0x116   :  { %596 = vmatprep.mubr.f32.mxu0 %v165_v52 }
 0x119   :  { %597 = vmatmul.mubr.f32.gmra.mxu0 %v164_v53  ;;  %v190_v53 = vld [vmem:[#allocation2 + $0x360] sm:$0xff] }
 0x11a   :  { %602 = vmatprep.mubr.f32.mxu0 %v167_v54 }
 0x11d   :  { %603 = vmatmul.mubr.f32.gmra.mxu0 %v166_v55 }
 0x11e   :  { %608 = vmatprep.mubr.f32.mxu0 %v169_v56 }
 0x121   :  { %609 = vmatmul.mubr.f32.gmra.mxu0 %v168_v57  ;;  %v193_v57 = vld [vmem:[#allocation2 + $0x378] sm:$0xff] }
 0x122   :  { %614 = vmatprep.mubr.f32.mxu0 %v171_v58 }
 0x125   :  { %615 = vmatmul.mubr.f32.gmra.mxu0 %v170_v59 }
 0x126   :  { %620 = vmatprep.mubr.f32.mxu0 %v173_v60 }
 0x129   :  { %621 = vmatmul.mubr.f32.gmra.mxu0 %v172_v61  ;;  %v192_v61 = vld [vmem:[#allocation2 + $0x370] sm:$0xff] }
 0x12a   :  { %626 = vmatprep.mubr.f32.mxu0 %v175_v62 }
 0x12d   :  { %627 = vmatmul.mubr.f32.gmra.mxu0 %v174_v0 }
 0x12e   :  { %632 = vmatprep.mubr.f32.mxu0 %v177_v1  ;;  %v195_v1 = vld [vmem:[#allocation2 + $0x388] sm:$0xff] }
 0x131   :  { %633 = vmatmul.mubr.f32.gmra.mxu0 %v176_v3 }
 0x132   :  { %638 = vmatprep.mubr.f32.mxu0 %v179_v4 }
 0x135   :  { %v352_v13 = vpop.f32.mrf.mxu0  ;;  %639 = vmatmul.mubr.f32.gmra.mxu0 %v178_v9 }
 0x136   :  { %644 = vmatprep.mubr.f32.mxu0 %v181_v11  ;;  %v353_v15 = vadd.f32 %v352_v13, %v1815_v10  ;;  %v197_v11 = vld [vmem:[#allocation2 + $0x398] sm:$0xff] }
 0x137   :  { %v354_v16 = vpop.f32.mrf.mxu0 }
 0x138   :  { %v355_v18 = vadd.f32 %v354_v16, %v1817_v12  ;;  %v735_v22 = vmax.f32 %v353_v15, 0.0  ;;  %v196_v16 = vld [vmem:[#allocation2 + $0x390] sm:$0xff] }
 0x139   :  { %v358_v19 = vpop.f32.mrf.mxu0  ;;  %645 = vmatmul.mubr.f32.gmra.mxu0 %v180_v14 }
 0x13a   :  { %650 = vmatprep.mubr.f32.mxu0 %v183_v17  ;;  %v736_v20 = vmax.f32 %v355_v18, 0.0  ;;  %v359_v23 = vadd.f32 %v358_v19, %v1815_v10 }
 0x13b   :  { %v360_v24 = vpop.f32.mrf.mxu0 }
 0x13c   :  { %v361_v26 = vadd.f32 %v360_v24, %v1817_v12  ;;  %966 = vmatprep.mubr.f32.mxu1 %v736_v20  ;;  %v737_v30 = vmax.f32 %v359_v23, 0.0  ;;  %v199_v20 = vld [vmem:[#allocation2 + $0x3a8] sm:$0xff]  ;;  %v198_v24 = vld [vmem:[#allocation2 + $0x3a0] sm:$0xff] }
 0x13d   :  { %v364_v27 = vpop.f32.mrf.mxu0  ;;  %651 = vmatmul.mubr.f32.gmra.mxu0 %v182_v21  ;;  %967 = vmatmul.mubr.f32.vlgmr.msra.gmra.mxu1 %v735_v22 }
 0x13e   :  { %v738_v28 = vmax.f32 %v361_v26, 0.0  ;;  %656 = vmatprep.mubr.f32.mxu0 %v185_v25  ;;  %v365_v31 = vadd.f32 %v364_v27, %v1815_v10 }
 0x13f   :  { %v366_v32 = vpop.f32.mrf.mxu0 }
 0x140   :  { %v367_v34 = vadd.f32 %v366_v32, %v1817_v12  ;;  %971 = vmatprep.mubr.f32.mxu1 %v738_v28  ;;  %v739_v38 = vmax.f32 %v365_v31, 0.0  ;;  %v201_v28 = vld [vmem:[#allocation2 + $0x3b8] sm:$0xff]  ;;  %v200_v32 = vld [vmem:[#allocation2 + $0x3b0] sm:$0xff] }
 0x141   :  { %v370_v35 = vpop.f32.mrf.mxu0  ;;  %657 = vmatmul.mubr.f32.gmra.mxu0 %v184_v29  ;;  %972 = vmatmul.mubr.f32.gmra.mxu1 %v737_v30 }
 0x142   :  { %v740_v36 = vmax.f32 %v367_v34, 0.0  ;;  %662 = vmatprep.mubr.f32.mxu0 %v187_v33  ;;  %v371_v39 = vadd.f32 %v370_v35, %v1815_v10 }
 0x143   :  { %v372_v40 = vpop.f32.mrf.mxu0 }
 0x144   :  { %v373_v42 = vadd.f32 %v372_v40, %v1817_v12  ;;  %976 = vmatprep.mubr.f32.mxu1 %v740_v36  ;;  %v741_v46 = vmax.f32 %v371_v39, 0.0  ;;  %v203_v36 = vld [vmem:[#allocation2 + $0x3c8] sm:$0xff]  ;;  %v202_v40 = vld [vmem:[#allocation2 + $0x3c0] sm:$0xff] }
 0x145   :  { %v376_v43 = vpop.f32.mrf.mxu0  ;;  %663 = vmatmul.mubr.f32.gmra.mxu0 %v186_v37  ;;  %977 = vmatmul.mubr.f32.gmra.mxu1 %v739_v38 }
 0x146   :  { %v742_v44 = vmax.f32 %v373_v42, 0.0  ;;  %668 = vmatprep.mubr.f32.mxu0 %v189_v41  ;;  %v377_v47 = vadd.f32 %v376_v43, %v1815_v10 }
 0x147   :  { %v378_v48 = vpop.f32.mrf.mxu0 }
 0x148   :  { %v379_v50 = vadd.f32 %v378_v48, %v1817_v12  ;;  %981 = vmatprep.mubr.f32.mxu1 %v742_v44  ;;  %v743_v54 = vmax.f32 %v377_v47, 0.0  ;;  %v205_v44 = vld [vmem:[#allocation2 + $0x3d8] sm:$0xff]  ;;  %v204_v48 = vld [vmem:[#allocation2 + $0x3d0] sm:$0xff] }
 0x149   :  { %v382_v51 = vpop.f32.mrf.mxu0  ;;  %669 = vmatmul.mubr.f32.gmra.mxu0 %v188_v45  ;;  %982 = vmatmul.mubr.f32.gmra.mxu1 %v741_v46 }
 0x14a   :  { %v744_v52 = vmax.f32 %v379_v50, 0.0  ;;  %674 = vmatprep.mubr.f32.mxu0 %v191_v49  ;;  %v383_v55 = vadd.f32 %v382_v51, %v1815_v10 }
 0x14b   :  { %v384_v56 = vpop.f32.mrf.mxu0 }
 0x14c   :  { %v385_v58 = vadd.f32 %v384_v56, %v1817_v12  ;;  %986 = vmatprep.mubr.f32.mxu1 %v744_v52  ;;  %v745_v62 = vmax.f32 %v383_v55, 0.0  ;;  %v207_v52 = vld [vmem:[#allocation2 + $0x3e8] sm:$0xff]  ;;  %v206_v56 = vld [vmem:[#allocation2 + $0x3e0] sm:$0xff] }
 0x14d   :  { %v388_v59 = vpop.f32.mrf.mxu0  ;;  %675 = vmatmul.mubr.f32.gmra.mxu0 %v190_v53  ;;  %987 = vmatmul.mubr.f32.gmra.mxu1 %v743_v54 }
 0x14e   :  { %v746_v60 = vmax.f32 %v385_v58, 0.0  ;;  %680 = vmatprep.mubr.f32.mxu0 %v193_v57  ;;  %v389_v63 = vadd.f32 %v388_v59, %v1815_v10 }
 0x14f   :  { %v390_v0 = vpop.f32.mrf.mxu0 }
 0x150   :  { %v391_v2 = vadd.f32 %v390_v0, %v1817_v12  ;;  %991 = vmatprep.mubr.f32.mxu1 %v746_v60  ;;  %v747_v6 = vmax.f32 %v389_v63, 0.0  ;;  %v209_v60 = vld [vmem:[#allocation2 + $0x3f8] sm:$0xff]  ;;  %v208_v0 = vld [vmem:[#allocation2 + $0x3f0] sm:$0xff] }
 0x151   :  { %v394_v3 = vpop.f32.mrf.mxu0  ;;  %681 = vmatmul.mubr.f32.gmra.mxu0 %v192_v61  ;;  %992 = vmatmul.mubr.f32.gmra.mxu1 %v745_v62 }
 0x152   :  { %v748_v4 = vmax.f32 %v391_v2, 0.0  ;;  %686 = vmatprep.mubr.f32.mxu0 %v195_v1  ;;  %v395_v8 = vadd.f32 %v394_v3, %v1815_v10 }
 0x153   :  { %v396_v9 = vpop.f32.mrf.mxu0 }
 0x154   :  { %v397_v13 = vadd.f32 %v396_v9, %v1817_v12  ;;  %996 = vmatprep.mubr.f32.mxu1 %v748_v4  ;;  %v749_v17 = vmax.f32 %v395_v8, 0.0 }
 0x155   :  { %v400_v14 = vpop.f32.mrf.mxu0  ;;  %687 = vmatmul.mubr.f32.gmra.mxu0 %v194_v5  ;;  %997 = vmatmul.mubr.f32.gmra.mxu1 %v747_v6 }
 0x156   :  { %v750_v15 = vmax.f32 %v397_v13, 0.0  ;;  %692 = vmatprep.mubr.f32.mxu0 %v197_v11  ;;  %v401_v18 = vadd.f32 %v400_v14, %v1815_v10 }
 0x157   :  { %v402_v19 = vpop.f32.mrf.mxu0 }
 0x158   :  { %v403_v21 = vadd.f32 %v402_v19, %v1817_v12  ;;  %1001 = vmatprep.mubr.f32.mxu1 %v750_v15  ;;  %v751_v25 = vmax.f32 %v401_v18, 0.0 }
 0x159   :  { %v406_v22 = vpop.f32.mrf.mxu0  ;;  %693 = vmatmul.mubr.f32.gmra.mxu0 %v196_v16  ;;  %1002 = vmatmul.mubr.f32.gmra.mxu1 %v749_v17 }
 0x15a   :  { %v752_v23 = vmax.f32 %v403_v21, 0.0  ;;  %698 = vmatprep.mubr.f32.mxu0 %v199_v20  ;;  %v407_v26 = vadd.f32 %v406_v22, %v1815_v10 }
 0x15b   :  { %v408_v27 = vpop.f32.mrf.mxu0 }
 0x15c   :  { %v409_v29 = vadd.f32 %v408_v27, %v1817_v12  ;;  %1006 = vmatprep.mubr.f32.mxu1 %v752_v23  ;;  %v753_v33 = vmax.f32 %v407_v26, 0.0 }
 0x15d   :  { %v412_v30 = vpop.f32.mrf.mxu0  ;;  %699 = vmatmul.mubr.f32.gmra.mxu0 %v198_v24  ;;  %1007 = vmatmul.mubr.f32.gmra.mxu1 %v751_v25 }
 0x15e   :  { %v754_v31 = vmax.f32 %v409_v29, 0.0  ;;  %704 = vmatprep.mubr.f32.mxu0 %v201_v28  ;;  %v413_v34 = vadd.f32 %v412_v30, %v1815_v10 }
 0x15f   :  { %v414_v35 = vpop.f32.mrf.mxu0 }
 0x160   :  { %v415_v37 = vadd.f32 %v414_v35, %v1817_v12  ;;  %1011 = vmatprep.mubr.f32.mxu1 %v754_v31  ;;  %v755_v41 = vmax.f32 %v413_v34, 0.0 }
 0x161   :  { %v418_v38 = vpop.f32.mrf.mxu0  ;;  %705 = vmatmul.mubr.f32.gmra.mxu0 %v200_v32  ;;  %1012 = vmatmul.mubr.f32.gmra.mxu1 %v753_v33 }
 0x162   :  { %v756_v39 = vmax.f32 %v415_v37, 0.0  ;;  %710 = vmatprep.mubr.f32.mxu0 %v203_v36  ;;  %v419_v42 = vadd.f32 %v418_v38, %v1815_v10 }
 0x163   :  { %v420_v43 = vpop.f32.mrf.mxu0 }
 0x164   :  { %v421_v45 = vadd.f32 %v420_v43, %v1817_v12  ;;  %1016 = vmatprep.mubr.f32.mxu1 %v756_v39  ;;  %v757_v49 = vmax.f32 %v419_v42, 0.0 }
 0x165   :  { %v424_v46 = vpop.f32.mrf.mxu0  ;;  %711 = vmatmul.mubr.f32.gmra.mxu0 %v202_v40  ;;  %1017 = vmatmul.mubr.f32.gmra.mxu1 %v755_v41 }
 0x166   :  { %v758_v47 = vmax.f32 %v421_v45, 0.0  ;;  %716 = vmatprep.mubr.f32.mxu0 %v205_v44  ;;  %v425_v50 = vadd.f32 %v424_v46, %v1815_v10 }
 0x167   :  { %v426_v51 = vpop.f32.mrf.mxu0 }
 0x168   :  { %v427_v53 = vadd.f32 %v426_v51, %v1817_v12  ;;  %1021 = vmatprep.mubr.f32.mxu1 %v758_v47  ;;  %v759_v57 = vmax.f32 %v425_v50, 0.0 }
 0x169   :  { %v430_v54 = vpop.f32.mrf.mxu0  ;;  %717 = vmatmul.mubr.f32.gmra.mxu0 %v204_v48  ;;  %1022 = vmatmul.mubr.f32.gmra.mxu1 %v757_v49 }
 0x16a   :  { %v760_v55 = vmax.f32 %v427_v53, 0.0  ;;  %722 = vmatprep.mubr.f32.mxu0 %v207_v52  ;;  %v431_v58 = vadd.f32 %v430_v54, %v1815_v10 }
 0x16b   :  { %v432_v59 = vpop.f32.mrf.mxu0 }
 0x16c   :  { %v433_v61 = vadd.f32 %v432_v59, %v1817_v12  ;;  %1026 = vmatprep.mubr.f32.mxu1 %v760_v55  ;;  %v761_v1 = vmax.f32 %v431_v58, 0.0  ;;  %v1442_v58 = vld [vmem:[#allocation8 + $0x78] sm:$0xff] }
 0x16d   :  { %v436_v62 = vpop.f32.mrf.mxu0  ;;  %723 = vmatmul.mubr.f32.gmra.mxu0 %v206_v56  ;;  %1027 = vmatmul.mubr.f32.gmra.mxu1 %v759_v57 }
 0x16e   :  { %v762_v63 = vmax.f32 %v433_v61, 0.0  ;;  %728 = vmatprep.mubr.f32.mxu0 %v209_v60  ;;  %v437_v2 = vadd.f32 %v436_v62, %v1815_v10  ;;  %1563 = vmatpush3.msra.mxu0 %v1442_v58 }
 0x16f   :  { %v438_v3 = vpop.f32.mrf.mxu0  ;;  %1564 = vmatprep.subr.mxu0 %v1724_v7 }
 0x170   :  { %v439_v4 = vadd.f32 %v438_v3, %v1817_v12  ;;  %1031 = vmatprep.mubr.f32.mxu1 %v762_v63  ;;  %v763_v8 = vmax.f32 %v437_v2, 0.0 }
 0x171   :  { %v442_v5 = vpop.f32.mrf.mxu0  ;;  %729 = vmatmul.mubr.f32.gmra.mxu0 %v208_v0  ;;  %1032 = vmatmul.mubr.f32.gmra.mxu1 %v761_v1 }
 0x172   :  { %v764_v6 = vmax.f32 %v439_v4, 0.0  ;;  %v443_v9 = vadd.f32 %v442_v5, %v1815_v10  ;;  %1594 = vmatprep.mubr.msk.f32.mxu0 %vm1725_vm0, %v1724_v7 }
 0x173   :  { %v444_v11 = vpop.f32.mrf.mxu0 }
 0x174   :  { %v445_v13 = vadd.f32 %v444_v11, %v1817_v12  ;;  %1036 = vmatprep.mubr.f32.mxu1 %v764_v6  ;;  %v765_v16 = vmax.f32 %v443_v9, 0.0 }
 0x175   :  { %v448_v14 = vpop.f32.mrf.mxu0  ;;  %1037 = vmatmul.mubr.f32.gmra.mxu1 %v763_v8 }
 0x176   :  { %v766_v15 = vmax.f32 %v445_v13, 0.0  ;;  %v449_v17 = vadd.f32 %v448_v14, %v1815_v10 }
 0x177   :  { %v450_v18 = vpop.f32.mrf.mxu0 }
 0x178   :  { %v451_v19 = vadd.f32 %v450_v18, %v1817_v12  ;;  %1041 = vmatprep.mubr.f32.mxu1 %v766_v15  ;;  %v767_v22 = vmax.f32 %v449_v17, 0.0 }
 0x179   :  { %v454_v20 = vpop.f32.mrf.mxu0  ;;  %1042 = vmatmul.mubr.f32.gmra.mxu1 %v765_v16 }
 0x17a   :  { %v768_v21 = vmax.f32 %v451_v19, 0.0  ;;  %v455_v23 = vadd.f32 %v454_v20, %v1815_v10 }
 0x17b   :  { %v456_v24 = vpop.f32.mrf.mxu0 }
 0x17c   :  { %v457_v25 = vadd.f32 %v456_v24, %v1817_v12  ;;  %1046 = vmatprep.mubr.f32.mxu1 %v768_v21  ;;  %v769_v28 = vmax.f32 %v455_v23, 0.0 }
 0x17d   :  { %v460_v26 = vpop.f32.mrf.mxu0  ;;  %1047 = vmatmul.mubr.f32.gmra.mxu1 %v767_v22  ;;  %v1441_v22 = vld [vmem:[#allocation8 + $0x70] sm:$0xff] }
 0x17e   :  { %v770_v27 = vmax.f32 %v457_v25, 0.0  ;;  %v461_v29 = vadd.f32 %v460_v26, %v1815_v10  ;;  %1565 = vmatpush3.msra.mxu0 %v1441_v22 }
 0x17f   :  { %v462_v30 = vpop.f32.mrf.mxu0  ;;  %1566 = vmatprep.subr.mxu0 %v1724_v7 }
 0x180   :  { %v463_v31 = vadd.f32 %v462_v30, %v1817_v12  ;;  %1051 = vmatprep.mubr.f32.mxu1 %v770_v27  ;;  %v771_v34 = vmax.f32 %v461_v29, 0.0 }
 0x181   :  { %v466_v32 = vpop.f32.mrf.mxu0  ;;  %1052 = vmatmul.mubr.f32.gmra.mxu1 %v769_v28 }
 0x182   :  { %v772_v33 = vmax.f32 %v463_v31, 0.0  ;;  %v467_v35 = vadd.f32 %v466_v32, %v1815_v10 }
 0x183   :  { %v468_v36 = vpop.f32.mrf.mxu0 }
 0x184   :  { %v469_v37 = vadd.f32 %v468_v36, %v1817_v12  ;;  %1056 = vmatprep.mubr.f32.mxu1 %v772_v33  ;;  %v773_v40 = vmax.f32 %v467_v35, 0.0 }
 0x185   :  { %v472_v38 = vpop.f32.mrf.mxu0  ;;  %1057 = vmatmul.mubr.f32.gmra.mxu1 %v771_v34 }
 0x186   :  { %v774_v39 = vmax.f32 %v469_v37, 0.0  ;;  %v473_v41 = vadd.f32 %v472_v38, %v1815_v10 }
 0x187   :  { %v474_v42 = vpop.f32.mrf.mxu0 }
 0x188   :  { %v475_v43 = vadd.f32 %v474_v42, %v1817_v12  ;;  %1061 = vmatprep.mubr.f32.mxu1 %v774_v39  ;;  %v775_v46 = vmax.f32 %v473_v41, 0.0 }
 0x189   :  { %v478_v44 = vpop.f32.mrf.mxu0  ;;  %1062 = vmatmul.mubr.f32.gmra.mxu1 %v773_v40 }
 0x18a   :  { %v776_v45 = vmax.f32 %v475_v43, 0.0  ;;  %v479_v47 = vadd.f32 %v478_v44, %v1815_v10 }
 0x18b   :  { %v480_v48 = vpop.f32.mrf.mxu0 }
 0x18c   :  { %v481_v49 = vadd.f32 %v480_v48, %v1817_v12  ;;  %1066 = vmatprep.mubr.f32.mxu1 %v776_v45  ;;  %v777_v52 = vmax.f32 %v479_v47, 0.0  ;;  %v1440_v47 = vld [vmem:[#allocation8 + $0x68] sm:$0xff] }
 0x18d   :  { %v484_v50 = vpop.f32.mrf.mxu0  ;;  %1067 = vmatmul.mubr.f32.gmra.mxu1 %v775_v46  ;;  %1567 = vmatpush3.msra.mxu0 %v1440_v47 }
 0x18e   :  { %v778_v51 = vmax.f32 %v481_v49, 0.0  ;;  %v485_v53 = vadd.f32 %v484_v50, %v1815_v10  ;;  %1568 = vmatprep.subr.mxu0 %v1724_v7 }
 0x18f   :  { %v486_v54 = vpop.f32.mrf.mxu0 }
 0x190   :  { %v487_v55 = vadd.f32 %v486_v54, %v1817_v12  ;;  %1071 = vmatprep.mubr.f32.mxu1 %v778_v51  ;;  %v779_v59 = vmax.f32 %v485_v53, 0.0 }
 0x191   :  { %v490_v56 = vpop.f32.mrf.mxu0  ;;  %1072 = vmatmul.mubr.f32.gmra.mxu1 %v777_v52 }
 0x192   :  { %v780_v57 = vmax.f32 %v487_v55, 0.0  ;;  %v491_v60 = vadd.f32 %v490_v56, %v1815_v10 }
 0x193   :  { %v492_v61 = vpop.f32.mrf.mxu0 }
 0x194   :  { %v493_v62 = vadd.f32 %v492_v61, %v1817_v12  ;;  %1076 = vmatprep.mubr.f32.mxu1 %v780_v57  ;;  %v781_v1 = vmax.f32 %v491_v60, 0.0 }
 0x195   :  { %v496_v63 = vpop.f32.mrf.mxu0  ;;  %1077 = vmatmul.mubr.f32.gmra.mxu1 %v779_v59 }
 0x196   :  { %v782_v0 = vmax.f32 %v493_v62, 0.0  ;;  %v497_v2 = vadd.f32 %v496_v63, %v1815_v10 }
 0x197   :  { %v498_v3 = vpop.f32.mrf.mxu0 }
 0x198   :  { %v499_v4 = vadd.f32 %v498_v3, %v1817_v12  ;;  %1081 = vmatprep.mubr.f32.mxu1 %v782_v0  ;;  %v783_v8 = vmax.f32 %v497_v2, 0.0 }
 0x199   :  { %v502_v5 = vpop.f32.mrf.mxu0  ;;  %1082 = vmatmul.mubr.f32.gmra.mxu1 %v781_v1 }
 0x19a   :  { %v784_v6 = vmax.f32 %v499_v4, 0.0  ;;  %v503_v9 = vadd.f32 %v502_v5, %v1815_v10 }
 0x19b   :  { %v504_v11 = vpop.f32.mrf.mxu0 }
 0x19c   :  { %v505_v13 = vadd.f32 %v504_v11, %v1817_v12  ;;  %1086 = vmatprep.mubr.f32.mxu1 %v784_v6  ;;  %v785_v16 = vmax.f32 %v503_v9, 0.0  ;;  %v1439_v9 = vld [vmem:[#allocation8 + $0x60] sm:$0xff] }
 0x19d   :  { %v508_v14 = vpop.f32.mrf.mxu0  ;;  %1087 = vmatmul.mubr.f32.gmra.mxu1 %v783_v8  ;;  %1569 = vmatpush3.msra.mxu0 %v1439_v9 }
 0x19e   :  { %v786_v15 = vmax.f32 %v505_v13, 0.0  ;;  %v509_v17 = vadd.f32 %v508_v14, %v1815_v10  ;;  %1570 = vmatprep.subr.mxu0 %v1724_v7 }
 0x19f   :  { %v510_v18 = vpop.f32.mrf.mxu0 }
 0x1a0   :  { %v511_v19 = vadd.f32 %v510_v18, %v1817_v12  ;;  %1091 = vmatprep.mubr.f32.mxu1 %v786_v15  ;;  %v787_v23 = vmax.f32 %v509_v17, 0.0 }
 0x1a1   :  { %v514_v20 = vpop.f32.mrf.mxu0  ;;  %1092 = vmatmul.mubr.f32.gmra.mxu1 %v785_v16 }
 0x1a2   :  { %v788_v21 = vmax.f32 %v511_v19, 0.0  ;;  %v515_v24 = vadd.f32 %v514_v20, %v1815_v10 }
 0x1a3   :  { %v516_v25 = vpop.f32.mrf.mxu0 }
 0x1a4   :  { %v517_v26 = vadd.f32 %v516_v25, %v1817_v12  ;;  %1096 = vmatprep.mubr.f32.mxu1 %v788_v21  ;;  %v789_v29 = vmax.f32 %v515_v24, 0.0 }
 0x1a5   :  { %v520_v27 = vpop.f32.mrf.mxu0  ;;  %1097 = vmatmul.mubr.f32.gmra.mxu1 %v787_v23 }
 0x1a6   :  { %v790_v28 = vmax.f32 %v517_v26, 0.0  ;;  %v521_v30 = vadd.f32 %v520_v27, %v1815_v10 }
 0x1a7   :  { %v522_v31 = vpop.f32.mrf.mxu0 }
 0x1a8   :  { %v523_v32 = vadd.f32 %v522_v31, %v1817_v12  ;;  %1101 = vmatprep.mubr.f32.mxu1 %v790_v28  ;;  %v791_v35 = vmax.f32 %v521_v30, 0.0 }
 0x1a9   :  { %v526_v33 = vpop.f32.mrf.mxu0  ;;  %1102 = vmatmul.mubr.f32.gmra.mxu1 %v789_v29 }
 0x1aa   :  { %v792_v34 = vmax.f32 %v523_v32, 0.0  ;;  %v527_v36 = vadd.f32 %v526_v33, %v1815_v10 }
 0x1ab   :  { %v528_v37 = vpop.f32.mrf.mxu0 }
 0x1ac   :  { %v529_v38 = vadd.f32 %v528_v37, %v1817_v12  ;;  %1106 = vmatprep.mubr.f32.mxu1 %v792_v34  ;;  %v793_v41 = vmax.f32 %v527_v36, 0.0  ;;  %v1438_v36 = vld [vmem:[#allocation8 + $0x58] sm:$0xff] }
 0x1ad   :  { %v532_v39 = vpop.f32.mrf.mxu0  ;;  %1107 = vmatmul.mubr.f32.gmra.mxu1 %v791_v35  ;;  %1571 = vmatpush3.msra.mxu0 %v1438_v36 }
 0x1ae   :  { %v794_v40 = vmax.f32 %v529_v38, 0.0  ;;  %v533_v42 = vadd.f32 %v532_v39, %v1815_v10  ;;  %1572 = vmatprep.subr.mxu0 %v1724_v7 }
 0x1af   :  { %v534_v43 = vpop.f32.mrf.mxu0 }
 0x1b0   :  { %v535_v44 = vadd.f32 %v534_v43, %v1817_v12  ;;  %1111 = vmatprep.mubr.f32.mxu1 %v794_v40  ;;  %v795_v48 = vmax.f32 %v533_v42, 0.0 }
 0x1b1   :  { %v538_v45 = vpop.f32.mrf.mxu0  ;;  %1112 = vmatmul.mubr.f32.gmra.mxu1 %v793_v41 }
 0x1b2   :  { %v796_v46 = vmax.f32 %v535_v44, 0.0  ;;  %v539_v49 = vadd.f32 %v538_v45, %v1815_v10 }
 0x1b3   :  { %v540_v50 = vpop.f32.mrf.mxu0 }
 0x1b4   :  { %v541_v51 = vadd.f32 %v540_v50, %v1817_v12  ;;  %1116 = vmatprep.mubr.f32.mxu1 %v796_v46  ;;  %v797_v54 = vmax.f32 %v539_v49, 0.0 }
 0x1b5   :  { %v544_v52 = vpop.f32.mrf.mxu0  ;;  %1117 = vmatmul.mubr.f32.gmra.mxu1 %v795_v48 }
 0x1b6   :  { %v798_v53 = vmax.f32 %v541_v51, 0.0  ;;  %v545_v55 = vadd.f32 %v544_v52, %v1815_v10 }
 0x1b7   :  { %v546_v56 = vpop.f32.mrf.mxu0 }
 0x1b8   :  { %v547_v57 = vadd.f32 %v546_v56, %v1817_v12  ;;  %1121 = vmatprep.mubr.f32.mxu1 %v798_v53  ;;  %v799_v60 = vmax.f32 %v545_v55, 0.0 }
 0x1b9   :  { %v550_v58 = vpop.f32.mrf.mxu0  ;;  %1122 = vmatmul.mubr.f32.gmra.mxu1 %v797_v54 }
 0x1ba   :  { %v800_v59 = vmax.f32 %v547_v57, 0.0  ;;  %v551_v61 = vadd.f32 %v550_v58, %v1815_v10 }
 0x1bb   :  { %v552_v62 = vpop.f32.mrf.mxu0 }
 0x1bc   :  { %v553_v63 = vadd.f32 %v552_v62, %v1817_v12  ;;  %1126 = vmatprep.mubr.f32.mxu1 %v800_v59  ;;  %v801_v2 = vmax.f32 %v551_v61, 0.0  ;;  %v1437_v61 = vld [vmem:[#allocation8 + $0x50] sm:$0xff] }
 0x1bd   :  { %v556_v0 = vpop.f32.mrf.mxu0  ;;  %1127 = vmatmul.mubr.f32.gmra.mxu1 %v799_v60  ;;  %1573 = vmatpush3.msra.mxu0 %v1437_v61 }
 0x1be   :  { %v802_v1 = vmax.f32 %v553_v63, 0.0  ;;  %v557_v3 = vadd.f32 %v556_v0, %v1815_v10  ;;  %1574 = vmatprep.subr.mxu0 %v1724_v7 }
 0x1bf   :  { %v558_v4 = vpop.f32.mrf.mxu0 }
 0x1c0   :  { %v559_v5 = vadd.f32 %v558_v4, %v1817_v12  ;;  %1131 = vmatprep.mubr.f32.mxu1 %v802_v1  ;;  %v803_v11 = vmax.f32 %v557_v3, 0.0 }
 0x1c1   :  { %v562_v6 = vpop.f32.mrf.mxu0  ;;  %1132 = vmatmul.mubr.f32.gmra.mxu1 %v801_v2 }
 0x1c2   :  { %v804_v8 = vmax.f32 %v559_v5, 0.0  ;;  %v563_v13 = vadd.f32 %v562_v6, %v1815_v10 }
 0x1c3   :  { %v564_v14 = vpop.f32.mrf.mxu0 }
 0x1c4   :  { %v565_v15 = vadd.f32 %v564_v14, %v1817_v12  ;;  %1136 = vmatprep.mubr.f32.mxu1 %v804_v8  ;;  %v805_v18 = vmax.f32 %v563_v13, 0.0 }
 0x1c5   :  { %v568_v16 = vpop.f32.mrf.mxu0  ;;  %1137 = vmatmul.mubr.f32.gmra.mxu1 %v803_v11 }
 0x1c6   :  { %v806_v17 = vmax.f32 %v565_v15, 0.0  ;;  %v569_v19 = vadd.f32 %v568_v16, %v1815_v10 }
 0x1c7   :  { %v570_v20 = vpop.f32.mrf.mxu0 }
 0x1c8   :  { %v571_v21 = vadd.f32 %v570_v20, %v1817_v12  ;;  %1141 = vmatprep.mubr.f32.mxu1 %v806_v17  ;;  %v807_v24 = vmax.f32 %v569_v19, 0.0 }
 0x1c9   :  { %v574_v22 = vpop.f32.mrf.mxu0  ;;  %1142 = vmatmul.mubr.f32.gmra.mxu1 %v805_v18 }
 0x1ca   :  { %v808_v23 = vmax.f32 %v571_v21, 0.0  ;;  %v575_v25 = vadd.f32 %v574_v22, %v1815_v10 }
 0x1cb   :  { %v576_v26 = vpop.f32.mrf.mxu0 }
 0x1cc   :  { %v577_v27 = vadd.f32 %v576_v26, %v1817_v12  ;;  %1146 = vmatprep.mubr.f32.mxu1 %v808_v23  ;;  %v809_v30 = vmax.f32 %v575_v25, 0.0  ;;  %v1436_v25 = vld [vmem:[#allocation8 + $0x48] sm:$0xff] }
 0x1cd   :  { %v580_v28 = vpop.f32.mrf.mxu0  ;;  %1147 = vmatmul.mubr.f32.gmra.mxu1 %v807_v24  ;;  %1575 = vmatpush3.msra.mxu0 %v1436_v25 }
 0x1ce   :  { %v810_v29 = vmax.f32 %v577_v27, 0.0  ;;  %v581_v31 = vadd.f32 %v580_v28, %v1815_v10  ;;  %1576 = vmatprep.subr.mxu0 %v1724_v7 }
 0x1cf   :  { %v582_v32 = vpop.f32.mrf.mxu0 }
 0x1d0   :  { %v583_v33 = vadd.f32 %v582_v32, %v1817_v12  ;;  %1151 = vmatprep.mubr.f32.mxu1 %v810_v29  ;;  %v811_v37 = vmax.f32 %v581_v31, 0.0 }
 0x1d1   :  { %v586_v34 = vpop.f32.mrf.mxu0  ;;  %1152 = vmatmul.mubr.f32.gmra.mxu1 %v809_v30 }
 0x1d2   :  { %v812_v35 = vmax.f32 %v583_v33, 0.0  ;;  %v587_v38 = vadd.f32 %v586_v34, %v1815_v10 }
 0x1d3   :  { %v588_v39 = vpop.f32.mrf.mxu0 }
 0x1d4   :  { %v589_v40 = vadd.f32 %v588_v39, %v1817_v12  ;;  %1156 = vmatprep.mubr.f32.mxu1 %v812_v35  ;;  %v813_v43 = vmax.f32 %v587_v38, 0.0 }
 0x1d5   :  { %v592_v41 = vpop.f32.mrf.mxu0  ;;  %1157 = vmatmul.mubr.f32.gmra.mxu1 %v811_v37 }
 0x1d6   :  { %v814_v42 = vmax.f32 %v589_v40, 0.0  ;;  %v593_v44 = vadd.f32 %v592_v41, %v1815_v10 }
 0x1d7   :  { %v594_v45 = vpop.f32.mrf.mxu0 }
 0x1d8   :  { %v595_v46 = vadd.f32 %v594_v45, %v1817_v12  ;;  %1161 = vmatprep.mubr.f32.mxu1 %v814_v42  ;;  %v815_v49 = vmax.f32 %v593_v44, 0.0 }
 0x1d9   :  { %v598_v47 = vpop.f32.mrf.mxu0  ;;  %1162 = vmatmul.mubr.f32.gmra.mxu1 %v813_v43  ;;  %v1929_v43 = vld [vmem:[%s2046_s4] ss:$0 sm:$0xff] }
 0x1da   :  { %v816_v48 = vmax.f32 %v595_v46, 0.0  ;;  %v599_v50 = vadd.f32 %v598_v47, %v1815_v10 }
 0x1db   :  { %v600_v51 = vpop.f32.mrf.mxu0 }
 0x1dc   :  { %v601_v52 = vadd.f32 %v600_v51, %v1817_v12  ;;  %1166 = vmatprep.mubr.f32.mxu1 %v816_v48  ;;  %v817_v55 = vmax.f32 %v599_v50, 0.0 }
 0x1dd   :  { %v604_v53 = vpop.f32.mrf.mxu0  ;;  %1167 = vmatmul.mubr.f32.gmra.mxu1 %v815_v49 }
 0x1de   :  { %v818_v54 = vmax.f32 %v601_v52, 0.0  ;;  %v605_v56 = vadd.f32 %v604_v53, %v1815_v10 }
 0x1df   :  { %v606_v57 = vpop.f32.mrf.mxu0 }
 0x1e0   :  { %v607_v58 = vadd.f32 %v606_v57, %v1817_v12  ;;  %1171 = vmatprep.mubr.f32.mxu1 %v818_v54  ;;  %v819_v62 = vmax.f32 %v605_v56, 0.0 }
 0x1e1   :  { %v610_v59 = vpop.f32.mrf.mxu0  ;;  %1172 = vmatmul.mubr.f32.gmra.mxu1 %v817_v55 }
 0x1e2   :  { %v820_v60 = vmax.f32 %v607_v58, 0.0  ;;  %v611_v63 = vadd.f32 %v610_v59, %v1815_v10 }
 0x1e3   :  { %v612_v0 = vpop.f32.mrf.mxu0 }
 0x1e4   :  { %v613_v1 = vadd.f32 %v612_v0, %v1817_v12  ;;  %1176 = vmatprep.mubr.f32.mxu1 %v820_v60  ;;  %v821_v4 = vmax.f32 %v611_v63, 0.0 }
 0x1e5   :  { %v616_v2 = vpop.f32.mrf.mxu0  ;;  %1177 = vmatmul.mubr.f32.gmra.mxu1 %v819_v62 }
 0x1e6   :  { %v822_v3 = vmax.f32 %v613_v1, 0.0  ;;  %v617_v5 = vadd.f32 %v616_v2, %v1815_v10 }
 0x1e7   :  { %v618_v6 = vpop.f32.mrf.mxu0 }
 0x1e8   :  { %v619_v8 = vadd.f32 %v618_v6, %v1817_v12  ;;  %1181 = vmatprep.mubr.f32.mxu1 %v822_v3  ;;  %v823_v13 = vmax.f32 %v617_v5, 0.0 }
 0x1e9   :  { %v622_v9 = vpop.f32.mrf.mxu0  ;;  %1182 = vmatmul.mubr.f32.gmra.mxu1 %v821_v4 }
 0x1ea   :  { %v824_v11 = vmax.f32 %v619_v8, 0.0  ;;  %v623_v14 = vadd.f32 %v622_v9, %v1815_v10 }
 0x1eb   :  { %v624_v15 = vpop.f32.mrf.mxu0 }
 0x1ec   :  { %v625_v16 = vadd.f32 %v624_v15, %v1817_v12  ;;  %1186 = vmatprep.mubr.f32.mxu1 %v824_v11  ;;  %v825_v19 = vmax.f32 %v623_v14, 0.0 }
 0x1ed   :  { %v628_v17 = vpop.f32.mrf.mxu0  ;;  %1187 = vmatmul.mubr.f32.gmra.mxu1 %v823_v13 }
 0x1ee   :  { %v826_v18 = vmax.f32 %v625_v16, 0.0  ;;  %v629_v20 = vadd.f32 %v628_v17, %v1815_v10 }
 0x1ef   :  { %v630_v21 = vpop.f32.mrf.mxu0 }
 0x1f0   :  { %v631_v22 = vadd.f32 %v630_v21, %v1817_v12  ;;  %1191 = vmatprep.mubr.f32.mxu1 %v826_v18  ;;  %v827_v26 = vmax.f32 %v629_v20, 0.0 }
 0x1f1   :  { %v634_v23 = vpop.f32.mrf.mxu0  ;;  %1192 = vmatmul.mubr.f32.gmra.mxu1 %v825_v19 }
 0x1f2   :  { %v828_v24 = vmax.f32 %v631_v22, 0.0  ;;  %v635_v27 = vadd.f32 %v634_v23, %v1815_v10 }
 0x1f3   :  { %v636_v28 = vpop.f32.mrf.mxu0 }
 0x1f4   :  { %v637_v29 = vadd.f32 %v636_v28, %v1817_v12  ;;  %1196 = vmatprep.mubr.f32.mxu1 %v828_v24  ;;  %v829_v32 = vmax.f32 %v635_v27, 0.0  ;;  %v1435_v24 = vld [vmem:[#allocation8 + $0x40] sm:$0xff] }
 0x1f5   :  { %v640_v30 = vpop.f32.mrf.mxu0  ;;  %1197 = vmatmul.mubr.f32.gmra.mxu1 %v827_v26  ;;  %1577 = vmatpush3.msra.mxu0 %v1435_v24 }
 0x1f6   :  { %v830_v31 = vmax.f32 %v637_v29, 0.0  ;;  %v641_v33 = vadd.f32 %v640_v30, %v1815_v10  ;;  %1578 = vmatprep.subr.mxu0 %v1724_v7 }
 0x1f7   :  { %v642_v34 = vpop.f32.mrf.mxu0 }
 0x1f8   :  { %v643_v35 = vadd.f32 %v642_v34, %v1817_v12  ;;  %1201 = vmatprep.mubr.f32.mxu1 %v830_v31  ;;  %v831_v38 = vmax.f32 %v641_v33, 0.0 }
 0x1f9   :  { %v646_v36 = vpop.f32.mrf.mxu0  ;;  %1202 = vmatmul.mubr.f32.gmra.mxu1 %v829_v32 }
 0x1fa   :  { %v832_v37 = vmax.f32 %v643_v35, 0.0  ;;  %v647_v39 = vadd.f32 %v646_v36, %v1815_v10 }
 0x1fb   :  { %v648_v40 = vpop.f32.mrf.mxu0 }
 0x1fc   :  { %v649_v41 = vadd.f32 %v648_v40, %v1817_v12  ;;  %1206 = vmatprep.mubr.f32.mxu1 %v832_v37  ;;  %v833_v46 = vmax.f32 %v647_v39, 0.0 }
 0x1fd   :  { %v652_v42 = vpop.f32.mrf.mxu0  ;;  %v968_v44 = vpop.f32.mrf.mxu1  ;;  %1207 = vmatmul.mubr.f32.gmra.mxu1 %v831_v38 }
 0x1fe   :  { %v834_v45 = vmax.f32 %v649_v41, 0.0  ;;  %v653_v47 = vadd.f32 %v652_v42, %v1815_v10  ;;  %v969_v50 = vadd.f32 %v1929_v43, %v968_v44  ;;  %v1434_v41 = vld [vmem:[#allocation8 + $0x38] sm:$0xff] }
 0x1ff   :  { %v654_v48 = vpop.f32.mrf.mxu0  ;;  %v970_v49 = vpop.f32.mrf.mxu1  ;;  %1579 = vmatpush3.msra.mxu0 %v1434_v41 }
 0x200   :  { %v655_v51 = vadd.f32 %v654_v48, %v1817_v12  ;;  %1211 = vmatprep.mubr.f32.mxu1 %v834_v45  ;;  %v835_v56 = vmax.f32 %v653_v47, 0.0  ;;  %v1287_v60 = vmax.f32 %v969_v50, 0.0  ;;  %1580 = vmatprep.subr.mxu0 %v1724_v7 }
 0x201   :  { %v658_v52 = vpop.f32.mrf.mxu0  ;;  %v973_v53 = vpop.f32.mrf.mxu1  ;;  %1212 = vmatmul.mubr.f32.gmra.mxu1 %v833_v46 }
 0x202   :  { %v836_v54 = vmax.f32 %v655_v51, 0.0  ;;  %v974_v55 = vadd.f32 %v1929_v43, %v973_v53  ;;  %v659_v57 = vadd.f32 %v658_v52, %v1815_v10 }
 0x203   :  { %v660_v58 = vpop.f32.mrf.mxu0  ;;  %v975_v59 = vpop.f32.mrf.mxu1 }
 0x204   :  { %v1288_v61 = vmax.f32 %v974_v55, 0.0  ;;  %v661_v62 = vadd.f32 %v660_v58, %v1817_v12  ;;  %1216 = vmatprep.mubr.f32.mxu1 %v836_v54  ;;  %v837_v4 = vmax.f32 %v659_v57, 0.0 }
 0x205   :  { %v664_v63 = vpop.f32.mrf.mxu0  ;;  %v978_v0 = vpop.f32.mrf.mxu1  ;;  %1217 = vmatmul.mubr.f32.gmra.mxu1 %v835_v56 }
 0x206   :  { %v1351_v1 = vadd.f32 %v1288_v61, %v1287_v60  ;;  %v838_v2 = vmax.f32 %v661_v62, 0.0  ;;  %v979_v3 = vadd.f32 %v1929_v43, %v978_v0  ;;  %v665_v5 = vadd.f32 %v664_v63, %v1815_v10 }
 0x207   :  { %v666_v6 = vpop.f32.mrf.mxu0  ;;  %v980_v8 = vpop.f32.mrf.mxu1 }
 0x208   :  { %v1289_v9 = vmax.f32 %v979_v3, 0.0  ;;  %v667_v11 = vadd.f32 %v666_v6, %v1817_v12  ;;  %1221 = vmatprep.mubr.f32.mxu1 %v838_v2  ;;  %v839_v18 = vmax.f32 %v665_v5, 0.0 }
 0x209   :  { %v670_v13 = vpop.f32.mrf.mxu0  ;;  %v983_v14 = vpop.f32.mrf.mxu1  ;;  %1222 = vmatmul.mubr.f32.gmra.mxu1 %v837_v4 }
 0x20a   :  { %v1352_v15 = vadd.f32 %v1351_v1, %v1289_v9  ;;  %v840_v16 = vmax.f32 %v667_v11, 0.0  ;;  %v984_v17 = vadd.f32 %v1929_v43, %v983_v14  ;;  %v671_v19 = vadd.f32 %v670_v13, %v1815_v10 }
 0x20b   :  { %v672_v20 = vpop.f32.mrf.mxu0  ;;  %v985_v21 = vpop.f32.mrf.mxu1 }
 0x20c   :  { %v1290_v22 = vmax.f32 %v984_v17, 0.0  ;;  %v673_v23 = vadd.f32 %v672_v20, %v1817_v12  ;;  %1226 = vmatprep.mubr.f32.mxu1 %v840_v16  ;;  %v841_v30 = vmax.f32 %v671_v19, 0.0 }
 0x20d   :  { %v676_v25 = vpop.f32.mrf.mxu0  ;;  %v988_v26 = vpop.f32.mrf.mxu1  ;;  %1227 = vmatmul.mubr.f32.gmra.mxu1 %v839_v18 }
 0x20e   :  { %v1353_v27 = vadd.f32 %v1352_v15, %v1290_v22  ;;  %v842_v28 = vmax.f32 %v673_v23, 0.0  ;;  %v989_v29 = vadd.f32 %v1929_v43, %v988_v26  ;;  %v677_v31 = vadd.f32 %v676_v25, %v1815_v10  ;;  %v1433_v26 = vld [vmem:[#allocation8 + $0x30] sm:$0xff] }
 0x20f   :  { %v678_v32 = vpop.f32.mrf.mxu0  ;;  %v990_v33 = vpop.f32.mrf.mxu1  ;;  %1581 = vmatpush3.msra.mxu0 %v1433_v26 }
 0x210   :  { %v1291_v34 = vmax.f32 %v989_v29, 0.0  ;;  %v679_v35 = vadd.f32 %v678_v32, %v1817_v12  ;;  %1231 = vmatprep.mubr.f32.mxu1 %v842_v28  ;;  %v843_v42 = vmax.f32 %v677_v31, 0.0  ;;  %1582 = vmatprep.subr.mxu0 %v1724_v7 }
 0x211   :  { %v682_v36 = vpop.f32.mrf.mxu0  ;;  %v993_v37 = vpop.f32.mrf.mxu1  ;;  %1232 = vmatmul.mubr.f32.gmra.mxu1 %v841_v30 }
 0x212   :  { %v1354_v38 = vadd.f32 %v1353_v27, %v1291_v34  ;;  %v844_v39 = vmax.f32 %v679_v35, 0.0  ;;  %v994_v40 = vadd.f32 %v1929_v43, %v993_v37  ;;  %v683_v44 = vadd.f32 %v682_v36, %v1815_v10 }
 0x213   :  { %v684_v45 = vpop.f32.mrf.mxu0  ;;  %v995_v46 = vpop.f32.mrf.mxu1 }
 0x214   :  { %v1292_v47 = vmax.f32 %v994_v40, 0.0  ;;  %v685_v48 = vadd.f32 %v684_v45, %v1817_v12  ;;  %1236 = vmatprep.mubr.f32.mxu1 %v844_v39  ;;  %v845_v54 = vmax.f32 %v683_v44, 0.0 }
 0x215   :  { %v688_v49 = vpop.f32.mrf.mxu0  ;;  %v998_v50 = vpop.f32.mrf.mxu1  ;;  %1237 = vmatmul.mubr.f32.gmra.mxu1 %v843_v42 }
 0x216   :  { %v1355_v51 = vadd.f32 %v1354_v38, %v1292_v47  ;;  %v846_v52 = vmax.f32 %v685_v48, 0.0  ;;  %v999_v53 = vadd.f32 %v1929_v43, %v998_v50  ;;  %v689_v55 = vadd.f32 %v688_v49, %v1815_v10 }
 0x217   :  { %v690_v56 = vpop.f32.mrf.mxu0  ;;  %v1000_v57 = vpop.f32.mrf.mxu1 }
 0x218   :  { %v1293_v58 = vmax.f32 %v999_v53, 0.0  ;;  %v691_v59 = vadd.f32 %v690_v56, %v1817_v12  ;;  %1241 = vmatprep.mubr.f32.mxu1 %v846_v52  ;;  %v847_v1 = vmax.f32 %v689_v55, 0.0 }
 0x219   :  { %v694_v60 = vpop.f32.mrf.mxu0  ;;  %v1003_v61 = vpop.f32.mrf.mxu1  ;;  %1242 = vmatmul.mubr.f32.gmra.mxu1 %v845_v54 }
 0x21a   :  { %v1356_v62 = vadd.f32 %v1355_v51, %v1293_v58  ;;  %v848_v63 = vmax.f32 %v691_v59, 0.0  ;;  %v1004_v0 = vadd.f32 %v1929_v43, %v1003_v61  ;;  %v695_v2 = vadd.f32 %v694_v60, %v1815_v10 }
 0x21b   :  { %v696_v3 = vpop.f32.mrf.mxu0  ;;  %v1005_v4 = vpop.f32.mrf.mxu1 }
 0x21c   :  { %v1294_v5 = vmax.f32 %v1004_v0, 0.0  ;;  %v697_v6 = vadd.f32 %v696_v3, %v1817_v12  ;;  %1246 = vmatprep.mubr.f32.mxu1 %v848_v63  ;;  %v849_v15 = vmax.f32 %v695_v2, 0.0 }
 0x21d   :  { %v700_v8 = vpop.f32.mrf.mxu0  ;;  %v1008_v9 = vpop.f32.mrf.mxu1  ;;  %1247 = vmatmul.mubr.f32.gmra.mxu1 %v847_v1 }
 0x21e   :  { %v1357_v11 = vadd.f32 %v1356_v62, %v1294_v5  ;;  %v850_v13 = vmax.f32 %v697_v6, 0.0  ;;  %v1009_v14 = vadd.f32 %v1929_v43, %v1008_v9  ;;  %v701_v16 = vadd.f32 %v700_v8, %v1815_v10  ;;  %v1432_v9 = vld [vmem:[#allocation8 + $0x28] sm:$0xff] }
 0x21f   :  { %v702_v17 = vpop.f32.mrf.mxu0  ;;  %v1010_v18 = vpop.f32.mrf.mxu1  ;;  %1583 = vmatpush3.msra.mxu0 %v1432_v9 }
 0x220   :  { %v1295_v19 = vmax.f32 %v1009_v14, 0.0  ;;  %v703_v20 = vadd.f32 %v702_v17, %v1817_v12  ;;  %1251 = vmatprep.mubr.f32.mxu1 %v850_v13  ;;  %v851_v27 = vmax.f32 %v701_v16, 0.0  ;;  %1584 = vmatprep.subr.mxu0 %v1724_v7 }
 0x221   :  { %v706_v21 = vpop.f32.mrf.mxu0  ;;  %v1013_v22 = vpop.f32.mrf.mxu1  ;;  %1252 = vmatmul.mubr.f32.gmra.mxu1 %v849_v15 }
 0x222   :  { %v1358_v23 = vadd.f32 %v1357_v11, %v1295_v19  ;;  %v852_v24 = vmax.f32 %v703_v20, 0.0  ;;  %v1014_v25 = vadd.f32 %v1929_v43, %v1013_v22  ;;  %v707_v28 = vadd.f32 %v706_v21, %v1815_v10 }
 0x223   :  { %v708_v29 = vpop.f32.mrf.mxu0  ;;  %v1015_v30 = vpop.f32.mrf.mxu1 }
 0x224   :  { %v1296_v31 = vmax.f32 %v1014_v25, 0.0  ;;  %v709_v32 = vadd.f32 %v708_v29, %v1817_v12  ;;  %1256 = vmatprep.mubr.f32.mxu1 %v852_v24  ;;  %v853_v38 = vmax.f32 %v707_v28, 0.0 }
 0x225   :  { %v712_v33 = vpop.f32.mrf.mxu0  ;;  %v1018_v34 = vpop.f32.mrf.mxu1  ;;  %1257 = vmatmul.mubr.f32.gmra.mxu1 %v851_v27 }
 0x226   :  { %v1359_v35 = vadd.f32 %v1358_v23, %v1296_v31  ;;  %v854_v36 = vmax.f32 %v709_v32, 0.0  ;;  %v1019_v37 = vadd.f32 %v1929_v43, %v1018_v34  ;;  %v713_v39 = vadd.f32 %v712_v33, %v1815_v10 }
 0x227   :  { %v714_v40 = vpop.f32.mrf.mxu0  ;;  %v1020_v41 = vpop.f32.mrf.mxu1 }
 0x228   :  { %v1297_v42 = vmax.f32 %v1019_v37, 0.0  ;;  %v715_v44 = vadd.f32 %v714_v40, %v1817_v12  ;;  %1261 = vmatprep.mubr.f32.mxu1 %v854_v36  ;;  %v855_v50 = vmax.f32 %v713_v39, 0.0  ;;  %v1431_v36 = vld [vmem:[#allocation8 + $0x20] sm:$0xff] }
 0x229   :  { %v718_v45 = vpop.f32.mrf.mxu0  ;;  %v1023_v46 = vpop.f32.mrf.mxu1  ;;  %1262 = vmatmul.mubr.f32.gmra.mxu1 %v853_v38  ;;  %1585 = vmatpush3.msra.mxu0 %v1431_v36 }
 0x22a   :  { %v1360_v47 = vadd.f32 %v1359_v35, %v1297_v42  ;;  %v856_v48 = vmax.f32 %v715_v44, 0.0  ;;  %v1024_v49 = vadd.f32 %v1929_v43, %v1023_v46  ;;  %v719_v51 = vadd.f32 %v718_v45, %v1815_v10  ;;  %1586 = vmatprep.subr.mxu0 %v1724_v7 }
 0x22b   :  { %v720_v52 = vpop.f32.mrf.mxu0  ;;  %v1025_v53 = vpop.f32.mrf.mxu1 }
 0x22c   :  { %v1298_v54 = vmax.f32 %v1024_v49, 0.0  ;;  %v721_v55 = vadd.f32 %v720_v52, %v1817_v12  ;;  %1266 = vmatprep.mubr.f32.mxu1 %v856_v48  ;;  %v857_v61 = vmax.f32 %v719_v51, 0.0 }
 0x22d   :  { %v724_v56 = vpop.f32.mrf.mxu0  ;;  %v1028_v57 = vpop.f32.mrf.mxu1  ;;  %1267 = vmatmul.mubr.f32.gmra.mxu1 %v855_v50 }
 0x22e   :  { %v1361_v58 = vadd.f32 %v1360_v47, %v1298_v54  ;;  %v858_v59 = vmax.f32 %v721_v55, 0.0  ;;  %v1029_v60 = vadd.f32 %v1929_v43, %v1028_v57  ;;  %v725_v62 = vadd.f32 %v724_v56, %v1815_v10 }
 0x22f   :  { %v726_v63 = vpop.f32.mrf.mxu0  ;;  %v1030_v0 = vpop.f32.mrf.mxu1 }
 0x230   :  { %v1299_v1 = vmax.f32 %v1029_v60, 0.0  ;;  %v727_v2 = vadd.f32 %v726_v63, %v1817_v12  ;;  %1271 = vmatprep.mubr.f32.mxu1 %v858_v59  ;;  %v859_v11 = vmax.f32 %v725_v62, 0.0 }
 0x231   :  { %v730_v3 = vpop.f32.mrf.mxu0  ;;  %v1033_v4 = vpop.f32.mrf.mxu1  ;;  %1272 = vmatmul.mubr.f32.gmra.mxu1 %v857_v61 }
 0x232   :  { %v1362_v5 = vadd.f32 %v1361_v58, %v1299_v1  ;;  %v860_v6 = vmax.f32 %v727_v2, 0.0  ;;  %v1034_v8 = vadd.f32 %v1929_v43, %v1033_v4  ;;  %v731_v13 = vadd.f32 %v730_v3, %v1815_v10  ;;  %v1430_v58 = vld [vmem:[#allocation8 + $0x18] sm:$0xff] }
 0x233   :  { %v732_v14 = vpop.f32.mrf.mxu0  ;;  %v1035_v15 = vpop.f32.mrf.mxu1  ;;  %1587 = vmatpush3.msra.mxu0 %v1430_v58 }
 0x234   :  { %v1300_v16 = vmax.f32 %v1034_v8, 0.0  ;;  %v733_v17 = vadd.f32 %v732_v14, %v1817_v12  ;;  %1276 = vmatprep.mubr.f32.mxu1 %v860_v6  ;;  %v861_v22 = vmax.f32 %v731_v13, 0.0  ;;  %1588 = vmatprep.subr.mxu0 %v1724_v7 }
 0x235   :  { %v1038_v18 = vpop.f32.mrf.mxu1  ;;  %1277 = vmatmul.mubr.f32.gmra.mxu1 %v859_v11 }
 0x236   :  { %v1363_v19 = vadd.f32 %v1362_v5, %v1300_v16  ;;  %v862_v20 = vmax.f32 %v733_v17, 0.0  ;;  %v1039_v21 = vadd.f32 %v1929_v43, %v1038_v18  ;;  %v1429_v18 = vld [vmem:[#allocation8 + $0x10] sm:$0xff] }
 0x237   :  { %v1040_v23 = vpop.f32.mrf.mxu1  ;;  %1589 = vmatpush3.msra.mxu0 %v1429_v18 }
 0x238   :  { %v1301_v24 = vmax.f32 %v1039_v21, 0.0  ;;  %1281 = vmatprep.mubr.f32.mxu1 %v862_v20  ;;  %1590 = vmatprep.subr.mxu0 %v1724_v7 }
 0x239   :  { %v1043_v10 = vpop.f32.mrf.mxu1  ;;  %1282 = vmatmul.mubr.f32.gmra.mxu1 %v861_v22 }
 0x23a   :  { %v1364_v25 = vadd.f32 %v1363_v19, %v1301_v24  ;;  %v1044_v26 = vadd.f32 %v1929_v43, %v1043_v10 }
 0x23b   :  { %v1045_v27 = vpop.f32.mrf.mxu1 }
 0x23c   :  { %v1302_v12 = vmax.f32 %v1044_v26, 0.0 }
 0x23d   :  { %v1048_v28 = vpop.f32.mrf.mxu1 }
 0x23e   :  { %v1365_v29 = vadd.f32 %v1364_v25, %v1302_v12  ;;  %v1049_v30 = vadd.f32 %v1929_v43, %v1048_v28 }
 0x23f   :  { %v1050_v31 = vpop.f32.mrf.mxu1 }
 0x240   :  { %v1303_v32 = vmax.f32 %v1049_v30, 0.0 }
 0x241   :  { %v1053_v33 = vpop.f32.mrf.mxu1 }
 0x242   :  { %v1366_v34 = vadd.f32 %v1365_v29, %v1303_v32  ;;  %v1054_v35 = vadd.f32 %v1929_v43, %v1053_v33 }
 0x243   :  { %v1055_v37 = vpop.f32.mrf.mxu1 }
 0x244   :  { %v1304_v38 = vmax.f32 %v1054_v35, 0.0  ;;  %v1428_v37 = vld [vmem:[#allocation8 + $0x8] sm:$0xff] }
 0x245   :  { %v1058_v39 = vpop.f32.mrf.mxu1  ;;  %1591 = vmatpush3.msra.mxu0 %v1428_v37 }
 0x246   :  { %v1367_v40 = vadd.f32 %v1366_v34, %v1304_v38  ;;  %v1059_v41 = vadd.f32 %v1929_v43, %v1058_v39  ;;  %1592 = vmatprep.subr.mxu0 %v1724_v7 }
 0x247   :  { %v1060_v42 = vpop.f32.mrf.mxu1 }
 0x248   :  { %v1305_v44 = vmax.f32 %v1059_v41, 0.0 }
 0x249   :  { %v1063_v45 = vpop.f32.mrf.mxu1 }
 0x24a   :  { %v1368_v46 = vadd.f32 %v1367_v40, %v1305_v44  ;;  %v1064_v47 = vadd.f32 %v1929_v43, %v1063_v45 }
 0x24b   :  { %v1065_v48 = vpop.f32.mrf.mxu1 }
 0x24c   :  { %v1306_v49 = vmax.f32 %v1064_v47, 0.0 }
 0x24d   :  { %v1068_v50 = vpop.f32.mrf.mxu1 }
 0x24e   :  { %v1369_v51 = vadd.f32 %v1368_v46, %v1306_v49  ;;  %v1069_v52 = vadd.f32 %v1929_v43, %v1068_v50 }
 0x24f   :  { %v1070_v53 = vpop.f32.mrf.mxu1 }
 0x250   :  { %v1307_v54 = vmax.f32 %v1069_v52, 0.0 }
 0x251   :  { %v1073_v55 = vpop.f32.mrf.mxu1 }
 0x252   :  { %v1370_v56 = vadd.f32 %v1369_v51, %v1307_v54  ;;  %v1074_v57 = vadd.f32 %v1929_v43, %v1073_v55 }
 0x253   :  { %v1075_v59 = vpop.f32.mrf.mxu1 }
 0x254   :  { %v1308_v60 = vmax.f32 %v1074_v57, 0.0 }
 0x255   :  { %v1078_v61 = vpop.f32.mrf.mxu1 }
 0x256   :  { %v1371_v62 = vadd.f32 %v1370_v56, %v1308_v60  ;;  %v1079_v63 = vadd.f32 %v1929_v43, %v1078_v61  ;;  %v1427_v60 = vld [vmem:[#allocation8] sm:$0xff] }
 0x257   :  { %v1080_v0 = vpop.f32.mrf.mxu1  ;;  %1593 = vmatpush3.msra.mxu0 %v1427_v60 }
 0x258   :  { %v1309_v1 = vmax.f32 %v1079_v63, 0.0 }
 0x259   :  { %v1083_v2 = vpop.f32.mrf.mxu1 }
 0x25a   :  { %v1372_v3 = vadd.f32 %v1371_v62, %v1309_v1  ;;  %v1084_v4 = vadd.f32 %v1929_v43, %v1083_v2 }
 0x25b   :  { %v1085_v5 = vpop.f32.mrf.mxu1 }
 0x25c   :  { %v1310_v6 = vmax.f32 %v1084_v4, 0.0 }
 0x25d   :  { %v1088_v8 = vpop.f32.mrf.mxu1 }
 0x25e   :  { %v1373_v9 = vadd.f32 %v1372_v3, %v1310_v6  ;;  %v1089_v11 = vadd.f32 %v1929_v43, %v1088_v8 }
 0x25f   :  { %v1090_v13 = vpop.f32.mrf.mxu1 }
 0x260   :  { %v1311_v14 = vmax.f32 %v1089_v11, 0.0 }
 0x261   :  { %v1093_v15 = vpop.f32.mrf.mxu1 }
 0x262   :  { %v1374_v16 = vadd.f32 %v1373_v9, %v1311_v14  ;;  %v1094_v17 = vadd.f32 %v1929_v43, %v1093_v15 }
 0x263   :  { %v1095_v19 = vpop.f32.mrf.mxu1 }
 0x264   :  { %v1312_v20 = vmax.f32 %v1094_v17, 0.0 }
 0x265   :  { %v1098_v21 = vpop.f32.mrf.mxu1 }
 0x266   :  { %v1375_v22 = vadd.f32 %v1374_v16, %v1312_v20  ;;  %v1099_v23 = vadd.f32 %v1929_v43, %v1098_v21 }
 0x267   :  { %v1100_v24 = vpop.f32.mrf.mxu1 }
 0x268   :  { %v1313_v10 = vmax.f32 %v1099_v23, 0.0 }
 0x269   :  { %v1103_v25 = vpop.f32.mrf.mxu1 }
 0x26a   :  { %v1376_v26 = vadd.f32 %v1375_v22, %v1313_v10  ;;  %v1104_v27 = vadd.f32 %v1929_v43, %v1103_v25 }
 0x26b   :  { %v1105_v12 = vpop.f32.mrf.mxu1 }
 0x26c   :  { %v1314_v28 = vmax.f32 %v1104_v27, 0.0 }
 0x26d   :  { %v1108_v29 = vpop.f32.mrf.mxu1 }
 0x26e   :  { %v1377_v30 = vadd.f32 %v1376_v26, %v1314_v28  ;;  %v1109_v31 = vadd.f32 %v1929_v43, %v1108_v29 }
 0x26f   :  { %v1110_v32 = vpop.f32.mrf.mxu1 }
 0x270   :  { %v1315_v33 = vmax.f32 %v1109_v31, 0.0 }
 0x271   :  { %v1113_v34 = vpop.f32.mrf.mxu1 }
 0x272   :  { %v1378_v35 = vadd.f32 %v1377_v30, %v1315_v33  ;;  %v1114_v36 = vadd.f32 %v1929_v43, %v1113_v34 }
 0x273   :  { %v1115_v38 = vpop.f32.mrf.mxu1 }
 0x274   :  { %v1316_v39 = vmax.f32 %v1114_v36, 0.0 }
 0x275   :  { %v1118_v40 = vpop.f32.mrf.mxu1 }
 0x276   :  { %v1379_v41 = vadd.f32 %v1378_v35, %v1316_v39  ;;  %v1119_v42 = vadd.f32 %v1929_v43, %v1118_v40 }
 0x277   :  { %v1120_v44 = vpop.f32.mrf.mxu1 }
 0x278   :  { %v1317_v45 = vmax.f32 %v1119_v42, 0.0 }
 0x279   :  { %v1123_v46 = vpop.f32.mrf.mxu1 }
 0x27a   :  { %v1380_v47 = vadd.f32 %v1379_v41, %v1317_v45  ;;  %v1124_v48 = vadd.f32 %v1929_v43, %v1123_v46 }
 0x27b   :  { %v1125_v49 = vpop.f32.mrf.mxu1 }
 0x27c   :  { %v1318_v50 = vmax.f32 %v1124_v48, 0.0 }
 0x27d   :  { %v1128_v51 = vpop.f32.mrf.mxu1 }
 0x27e   :  { %v1999_v52 = vadd.f32 %v1380_v47, %v1318_v50  ;;  %v1129_v24 = vadd.f32 %v1929_v43, %v1128_v51 }
 0x27f   :  { %v1130_v53 = vpop.f32.mrf.mxu1 }
 0x280   :  { %v1319_v28 = vmax.f32 %v1129_v24, 0.0 }
 0x281   :  { %v1133_v54 = vpop.f32.mrf.mxu1 }
 0x282   :  { %v1134_v22 = vadd.f32 %v1929_v43, %v1133_v54 }
 0x283   :  { %v1135_v55 = vpop.f32.mrf.mxu1 }
 0x284   :  { %v1320_v26 = vmax.f32 %v1134_v22, 0.0 }
 0x285   :  { %v1138_v56 = vpop.f32.mrf.mxu1 }
 0x286   :  { %v1139_v10 = vadd.f32 %v1929_v43, %v1138_v56  ;;  %v1388_v32 = vadd.f32 %v1320_v26, %v1319_v28 }
 0x287   :  { %v1140_v57 = vpop.f32.mrf.mxu1 }
 0x288   :  { %v1321_v29 = vmax.f32 %v1139_v10, 0.0 }
 0x289   :  { %v1143_v58 = vpop.f32.mrf.mxu1 }
 0x28a   :  { %v1144_v27 = vadd.f32 %v1929_v43, %v1143_v58  ;;  %v1389_v36 = vadd.f32 %v1388_v32, %v1321_v29 }
 0x28b   :  { %v1145_v59 = vpop.f32.mrf.mxu1 }
 0x28c   :  { %v1322_v33 = vmax.f32 %v1144_v27, 0.0 }
 0x28d   :  { %v1148_v61 = vpop.f32.mrf.mxu1 }
 0x28e   :  { %v1149_v30 = vadd.f32 %v1929_v43, %v1148_v61  ;;  %v1390_v40 = vadd.f32 %v1389_v36, %v1322_v33 }
 0x28f   :  { %v1150_v62 = vpop.f32.mrf.mxu1 }
 0x290   :  { %v1323_v37 = vmax.f32 %v1149_v30, 0.0 }
 0x291   :  { %v1153_v63 = vpop.f32.mrf.mxu1 }
 0x292   :  { %v1154_v34 = vadd.f32 %v1929_v43, %v1153_v63  ;;  %v1391_v45 = vadd.f32 %v1390_v40, %v1323_v37 }
 0x293   :  { %v1155_v0 = vpop.f32.mrf.mxu1 }
 0x294   :  { %v1324_v41 = vmax.f32 %v1154_v34, 0.0 }
 0x295   :  { %v1158_v1 = vpop.f32.mrf.mxu1 }
 0x296   :  { %v1159_v38 = vadd.f32 %v1929_v43, %v1158_v1  ;;  %v1392_v49 = vadd.f32 %v1391_v45, %v1324_v41 }
 0x297   :  { %v1160_v2 = vpop.f32.mrf.mxu1 }
 0x298   :  { %v1325_v46 = vmax.f32 %v1159_v38, 0.0 }
 0x299   :  { %v1163_v3 = vpop.f32.mrf.mxu1 }
 0x29a   :  { %v1164_v42 = vadd.f32 %v1929_v43, %v1163_v3  ;;  %v1393_v54 = vadd.f32 %v1392_v49, %v1325_v46 }
 0x29b   :  { %v1165_v4 = vpop.f32.mrf.mxu1 }
 0x29c   :  { %v1326_v50 = vmax.f32 %v1164_v42, 0.0 }
 0x29d   :  { %v1168_v5 = vpop.f32.mrf.mxu1 }
 0x29e   :  { %v1169_v47 = vadd.f32 %v1929_v43, %v1168_v5  ;;  %v1394_v58 = vadd.f32 %v1393_v54, %v1326_v50 }
 0x29f   :  { %v1170_v6 = vpop.f32.mrf.mxu1 }
 0x2a0   :  { %v1327_v55 = vmax.f32 %v1169_v47, 0.0 }
 0x2a1   :  { %v1173_v8 = vpop.f32.mrf.mxu1 }
 0x2a2   :  { %v1174_v51 = vadd.f32 %v1929_v43, %v1173_v8  ;;  %v1395_v62 = vadd.f32 %v1394_v58, %v1327_v55 }
 0x2a3   :  { %v1175_v9 = vpop.f32.mrf.mxu1 }
 0x2a4   :  { %v1328_v59 = vmax.f32 %v1174_v51, 0.0 }
 0x2a5   :  { %v1178_v11 = vpop.f32.mrf.mxu1 }
 0x2a6   :  { %v1179_v56 = vadd.f32 %v1929_v43, %v1178_v11  ;;  %v1396_v2 = vadd.f32 %v1395_v62, %v1328_v59 }
 0x2a7   :  { %v1180_v13 = vpop.f32.mrf.mxu1 }
 0x2a8   :  { %v1329_v63 = vmax.f32 %v1179_v56, 0.0 }
 0x2a9   :  { %v1183_v14 = vpop.f32.mrf.mxu1 }
 0x2aa   :  { %v1184_v60 = vadd.f32 %v1929_v43, %v1183_v14  ;;  %v1397_v6 = vadd.f32 %v1396_v2, %v1329_v63 }
 0x2ab   :  { %v1185_v15 = vpop.f32.mrf.mxu1 }
 0x2ac   :  { %v1330_v3 = vmax.f32 %v1184_v60, 0.0 }
 0x2ad   :  { %v1188_v16 = vpop.f32.mrf.mxu1 }
 0x2ae   :  { %v1189_v0 = vadd.f32 %v1929_v43, %v1188_v16  ;;  %v1398_v13 = vadd.f32 %v1397_v6, %v1330_v3 }
 0x2af   :  { %v1190_v17 = vpop.f32.mrf.mxu1 }
 0x2b0   :  { %v1331_v8 = vmax.f32 %v1189_v0, 0.0 }
 0x2b1   :  { %v1193_v18 = vpop.f32.mrf.mxu1 }
 0x2b2   :  { %v1194_v4 = vadd.f32 %v1929_v43, %v1193_v18 }
 0x2b3   :  { %v1195_v19 = vpop.f32.mrf.mxu1 }
 0x2b4   :  { %v1332_v15 = vmax.f32 %v1194_v4, 0.0  ;;  %v1399_v19 = vadd.f32 %v1398_v13, %v1331_v8 }
 0x2b5   :  { %v1198_v7 = vpop.f32.mrf.mxu1 }
 0x2b6   :  { %v1199_v9 = vadd.f32 %v1929_v43, %v1198_v7 }
 0x2b7   :  { %v1200_v20 = vpop.f32.mrf.mxu1 }
 0x2b8   :  { %v1333_v20 = vmax.f32 %v1199_v9, 0.0  ;;  %v1382_v9 = vrot.slane %v1999_v52, 4 }
 0x2b9   :  { %v1203_v21 = vpop.f32.mrf.mxu1 }
 0x2ba   :  { %v1204_v14 = vadd.f32 %v1929_v43, %v1203_v21 }
 0x2bb   :  { %v1205_v23 = vpop.f32.mrf.mxu1 }
 0x2bc   :  { %v1400_v23 = vadd.f32 %v1399_v19, %v1332_v15  ;;  %v1334_v24 = vmax.f32 %v1204_v14, 0.0 }
 0x2bd   :  { %v1208_v25 = vpop.f32.mrf.mxu1 }
 0x2be   :  { %v1209_v16 = vadd.f32 %v1929_v43, %v1208_v25  ;;  %v1401_v26 = vadd.f32 %v1400_v23, %v1333_v20 }
 0x2bf   :  { %v1210_v12 = vpop.f32.mrf.mxu1 }
 0x2c0   :  { %v1335_v27 = vmax.f32 %v1209_v16, 0.0  ;;  %v1402_v28 = vadd.f32 %v1401_v26, %v1334_v24  ;;  %v1383_v16 = vadd.f32 %v1382_v9, %v1999_v52 }
 0x2c1   :  { %v1213_v31 = vpop.f32.mrf.mxu1 }
 0x2c2   :  { %v1214_v18 = vadd.f32 %v1929_v43, %v1213_v31  ;;  %v1403_v32 = vadd.f32 %v1402_v28, %v1335_v27  ;;  %v1384_v27 = vrot.slane %v1383_v16, 2 }
 0x2c3   :  { %v1215_v35 = vpop.f32.mrf.mxu1 }
 0x2c4   :  { %v1336_v29 = vmax.f32 %v1214_v18, 0.0 }
 0x2c5   :  { %v1218_v39 = vpop.f32.mrf.mxu1 }
 0x2c6   :  { %v1219_v7 = vadd.f32 %v1929_v43, %v1218_v39  ;;  %v1404_v35 = vadd.f32 %v1403_v32, %v1336_v29  ;;  %v1385_v29 = vadd.f32 %v1384_v27, %v1383_v16 }
 0x2c7   :  { %v1220_v44 = vpop.f32.mrf.mxu1 }
 0x2c8   :  { %v1337_v33 = vmax.f32 %v1219_v7, 0.0  ;;  %v1386_v32 = vrot.slane %v1385_v29, 1 }
 0x2c9   :  { %v1223_v48 = vpop.f32.mrf.mxu1 }
 0x2ca   :  { %v1224_v21 = vadd.f32 %v1929_v43, %v1223_v48  ;;  %v1405_v38 = vadd.f32 %v1404_v35, %v1337_v33 }
 0x2cb   :  { %v1225_v53 = vpop.f32.mrf.mxu1 }
 0x2cc   :  { %v1338_v36 = vmax.f32 %v1224_v21, 0.0 }
 0x2cd   :  { %v1228_v57 = vpop.f32.mrf.mxu1 }
 0x2ce   :  { %v1229_v25 = vadd.f32 %v1929_v43, %v1228_v57  ;;  %v1406_v42 = vadd.f32 %v1405_v38, %v1338_v36 }
 0x2cf   :  { %v1230_v61 = vpop.f32.mrf.mxu1 }
 0x2d0   :  { %v1339_v40 = vmax.f32 %v1229_v25, 0.0 }
 0x2d1   :  { %v1233_v1 = vpop.f32.mrf.mxu1 }
 0x2d2   :  { %v1234_v31 = vadd.f32 %v1929_v43, %v1233_v1  ;;  %v1407_v47 = vadd.f32 %v1406_v42, %v1339_v40 }
 0x2d3   :  { %v1235_v5 = vpop.f32.mrf.mxu1 }
 0x2d4   :  { %v1340_v44 = vmax.f32 %v1234_v31, 0.0 }
 0x2d5   :  { %v1238_v11 = vpop.f32.mrf.mxu1 }
 0x2d6   :  { %v1239_v39 = vadd.f32 %v1929_v43, %v1238_v11  ;;  %v1408_v51 = vadd.f32 %v1407_v47, %v1340_v44 }
 0x2d7   :  { %v1240_v17 = vpop.f32.mrf.mxu1 }
 0x2d8   :  { %v1341_v48 = vmax.f32 %v1239_v39, 0.0 }
 0x2d9   :  { %v1243_v22 = vpop.f32.mrf.mxu1 }
 0x2da   :  { %v1244_v45 = vadd.f32 %v1929_v43, %v1243_v22  ;;  %v1409_v56 = vadd.f32 %v1408_v51, %v1341_v48 }
 0x2db   :  { %v1245_v10 = vpop.f32.mrf.mxu1 }
 0x2dc   :  { %v1342_v53 = vmax.f32 %v1244_v45, 0.0 }
 0x2dd   :  { %v1248_v12 = vpop.f32.mrf.mxu1 }
 0x2de   :  { %v1249_v49 = vadd.f32 %v1929_v43, %v1248_v12  ;;  %v1410_v60 = vadd.f32 %v1409_v56, %v1342_v53 }
 0x2df   :  { %v1250_v30 = vpop.f32.mrf.mxu1 }
 0x2e0   :  { %v1343_v57 = vmax.f32 %v1249_v49, 0.0 }
 0x2e1   :  { %v1253_v34 = vpop.f32.mrf.mxu1 }
 0x2e2   :  { %v1254_v54 = vadd.f32 %v1929_v43, %v1253_v34  ;;  %v1411_v0 = vadd.f32 %v1410_v60, %v1343_v57  ;;  %v1387_v34 = vadd.f32 %v1386_v32, %v1385_v29 }
 0x2e3   :  { %v1255_v37 = vpop.f32.mrf.mxu1 }
 0x2e4   :  { %v1344_v61 = vmax.f32 %v1254_v54, 0.0  ;;  %v1425_v36 = vmul.f32 0.00390625, %v1387_v34 }
 0x2e5   :  { %v1258_v41 = vpop.f32.mrf.mxu1 }
 0x2e6   :  { %v1259_v58 = vadd.f32 %v1929_v43, %v1258_v41  ;;  %v1412_v4 = vadd.f32 %v1411_v0, %v1344_v61 }
 0x2e7   :  { %v1260_v46 = vpop.f32.mrf.mxu1 }
 0x2e8   :  { %v1345_v1 = vmax.f32 %v1259_v58, 0.0 }
 0x2e9   :  { %v1263_v50 = vpop.f32.mrf.mxu1 }
 0x2ea   :  { %v1264_v62 = vadd.f32 %v1929_v43, %v1263_v50  ;;  %v1413_v11 = vadd.f32 %v1412_v4, %v1345_v1 }
 0x2eb   :  { %v1265_v55 = vpop.f32.mrf.mxu1 }
 0x2ec   :  { %v1346_v5 = vmax.f32 %v1264_v62, 0.0 }
 0x2ed   :  { %v1268_v59 = vpop.f32.mrf.mxu1 }
 0x2ee   :  { %v1269_v2 = vadd.f32 %v1929_v43, %v1268_v59  ;;  %v1414_v14 = vadd.f32 %v1413_v11, %v1346_v5 }
 0x2ef   :  { %v1270_v63 = vpop.f32.mrf.mxu1 }
 0x2f0   :  { %v1347_v13 = vmax.f32 %v1269_v2, 0.0 }
 0x2f1   :  { %v1273_v3 = vpop.f32.mrf.mxu1 }
 0x2f2   :  { %v1274_v6 = vadd.f32 %v1929_v43, %v1273_v3  ;;  %v1415_v22 = vadd.f32 %v1414_v14, %v1347_v13 }
 0x2f3   :  { %v1275_v8 = vpop.f32.mrf.mxu1 }
 0x2f4   :  { %v1348_v17 = vmax.f32 %v1274_v6, 0.0 }
 0x2f5   :  { %v1278_v15 = vpop.f32.mrf.mxu1 }
 0x2f6   :  { %v1279_v19 = vadd.f32 %v1929_v43, %v1278_v15  ;;  %v1416_v18 = vadd.f32 %v1415_v22, %v1348_v17 }
 0x2f7   :  { %v1280_v20 = vpop.f32.mrf.mxu1 }
 0x2f8   :  { %v1349_v23 = vmax.f32 %v1279_v19, 0.0 }
 0x2f9   :  { %v1283_v24 = vpop.f32.mrf.mxu1 }
 0x2fa   :  { %v1284_v10 = vadd.f32 %v1929_v43, %v1283_v24  ;;  %v1417_v7 = vadd.f32 %v1416_v18, %v1349_v23  ;;  %v1544_v43 = vld [vmem:[%s2048_s6] ss:$0 sm:$0xff] }
 0x2fb   :  { %v1285_v26 = vpop.f32.mrf.mxu1 }
 0x2fc   :  { %v1350_v12 = vmax.f32 %v1284_v10, 0.0 }
 0x2fe   :  { %v1418_v28 = vadd.f32 %v1417_v7, %v1350_v12 }
 0x300   :  { %v1419_v21 = vrot.slane %v1418_v28, 4 }
 0x302   :  { %v1420_v30 = vadd.f32 %v1419_v21, %v1418_v28 }
 0x304   :  { %v1421_v33 = vrot.slane %v1420_v30, 2 }
 0x306   :  { %v1422_v25 = vadd.f32 %v1421_v33, %v1420_v30 }
 0x308   :  { %v1423_v35 = vrot.slane %v1422_v25, 1 }
 0x30a   :  { %v1424_v52 = vadd.f32 %v1423_v35, %v1422_v25 }
 0x30c   :  { %v1426_v31 = vmul.f32 0.00390625, %v1424_v52 }
 0x30e   :  { %v1453_v37 = vsel %vm1452_vm1, %v1426_v31, %v1425_v36 }
 0x30f   :  { %1595 = vmatmul.mubr.f32.vlgmr.msra.gmra.mxu0 %v1453_v37 }
 0x3cf   :  { %v1521_v38 = vpop.f32.mrf.mxu0 }
 0x3d0   :  { %v1522_v40 = vadd.f32 %v1544_v43, %v1521_v38 }
 0x3d1   :  { %v1596_v39 = vpop.f32.mrf.mxu0 }
 0x3d2   :  { %1525 = vst [vmem:[#allocation10] sm:$0x3] %v1522_v40 }
 0x3d3   :  { %1699 = shalt.err (!%p1696_p10)
}
 0x3d4   :  { %1535 = dma.vmem_to_hbm [thread:$0]  %s1533_s26, 32, %s2049_s7, [#allocation4]  }
 0x3d5   :  { %1714 = dma.done.wait [#allocation4], 32  }
 0x3d6   :  { %1715 = vsyncadd [#allocation4], 4294967264 }
 0x3d7   :  { %1539 = vsyncpa [#allocation3], 1 }
 0x3d8   :  { %1540 = vsyncpa [#allocation6], 1 }
 0x3d9   :  { %1541 = vsyncpa [#allocation9], 1 }
 0x3da   :  { %1542 = vsyncpa [#allocation4], 1 }

</bundles_post_ra>
